<compile_context>
chip_gen: v5e
topology: v5e:2x2
jax: 0.10.0
libtpu: 0.0.40
codegen_flags: <defaults>
</compile_context>

<pallas_src>
import functools

import jax
import jax.numpy as jnp
from jax import lax
from jax.experimental import pallas as pl
from jax.experimental.pallas import tpu as pltpu

BN_EPS = 1e-5


def conv_stats_kernel(x_ref, w_ref, conv_ref, sum_ref, m2_ref,
                      *, kh, kw, stride, oh, ow):
    """One padded image -> conv (Cout, OH*OW) + per-channel BN partials."""
    # x_ref: (Cin, Hp, Wp) bf16   w_ref: (KH*KW, Cout, Cin) bf16
    # conv_ref: (Cout, OH*OW) bf16   sum_ref / m2_ref: (1, Cout) f32
    xv = x_ref[...]
    cout = w_ref.shape[1]
    s = oh * ow
    span_h = (oh - 1) * stride + 1
    span_w = (ow - 1) * stride + 1

    acc = jnp.zeros((cout, s), jnp.float32)
    for i in range(kh):                       # static unroll over taps
        for j in range(kw):
            tap = xv[:, i:i + span_h:stride, j:j + span_w:stride]  # (Cin,OH,OW)
            tap2d = tap.reshape(tap.shape[0], s)                   # (Cin,OH*OW)
            acc = acc + jnp.dot(w_ref[i * kw + j], tap2d,
                                preferred_element_type=jnp.float32)

    conv_ref[...] = acc.astype(conv_ref.dtype)         # bf16 intermediate

    # Per-tile BN partials (f32, pre-downcast): sum and mean-centered M2.
    tile_sum = jnp.sum(acc, axis=1)                     # (Cout,)
    tile_mean = tile_sum * (1.0 / s)
    centered = acc - tile_mean[:, None]
    tile_m2 = jnp.sum(centered * centered, axis=1)      # (Cout,)
    sum_ref[...] = tile_sum[None, :]
    m2_ref[...] = tile_m2[None, :]


def bn_relu_kernel(scale_ref, bias_ref, conv_ref, out_ref):
    # scale/bias: (Cout, 1) f32; conv: (Cout, OH*OW) bf16; out: (Cout, OH*OW) f32.
    c = conv_ref[...].astype(jnp.float32)
    out_ref[...] = jnp.maximum(c * scale_ref[...] + bias_ref[...], 0.0)


def conv_block_forward(x, weight, gamma, beta, *, stride=1, padding=0):
    """x: (N, Cin, H, W) f32 NCHW, weight: (Cout, Cin, KH, KW) f32."""
    n, cin, h, w = x.shape
    cout, cin_w, kh, kw = weight.shape
    assert cin == cin_w

    oh = (h + 2 * padding - kh) // stride + 1
    ow = (w + 2 * padding - kw) // stride + 1
    s = oh * ow
    hp = h + 2 * padding
    wp = w + 2 * padding

    # Single cheap pass over x: pad + cast to bf16 (no HBM im2col).
    x_pad = jnp.pad(
        x, ((0, 0), (0, 0), (padding, padding), (padding, padding))
    ).astype(jnp.bfloat16)
    # Weight as (KH*KW, Cout, Cin), tap-major (t = i*KW + j), bf16 (tiny).
    w_taps = jnp.transpose(
        weight.reshape(cout, cin, kh * kw), (2, 0, 1)).astype(jnp.bfloat16)

    kernel1 = functools.partial(conv_stats_kernel, kh=kh, kw=kw,
                                stride=stride, oh=oh, ow=ow)

    # ---- pass 1: fused im2col + conv GEMM + BN partial statistics ----
    conv_t, tile_sum, tile_m2 = pl.pallas_call(
        kernel1,
        out_shape=(
            jax.ShapeDtypeStruct((n, cout, s), jnp.bfloat16),
            jax.ShapeDtypeStruct((n, 1, cout), jnp.float32),
            jax.ShapeDtypeStruct((n, 1, cout), jnp.float32),
        ),
        grid=(n,),
        in_specs=[
            pl.BlockSpec((None, cin, hp, wp), lambda b: (b, 0, 0, 0)),
            pl.BlockSpec((kh * kw, cout, cin), lambda b: (0, 0, 0)),
        ],
        out_specs=(
            pl.BlockSpec((None, cout, s), lambda b: (b, 0, 0)),
            pl.BlockSpec((None, 1, cout), lambda b: (b, 0, 0)),
            pl.BlockSpec((None, 1, cout), lambda b: (b, 0, 0)),
        ),
        compiler_params=pltpu.CompilerParams(
            dimension_semantics=("parallel",)),
    )(x_pad, w_taps)

    # ---- O(Cout) BN fold, Chan's parallel-variance combine across tiles ----
    tile_sum = tile_sum[:, 0, :]                        # (N, Cout)
    tile_m2 = tile_m2[:, 0, :]                          # (N, Cout)
    cnt = float(s)
    total = float(n * s)
    mean = jnp.sum(tile_sum, axis=0) / total            # (Cout,)
    tile_mean = tile_sum / cnt
    m2 = jnp.sum(tile_m2, axis=0) + cnt * jnp.sum(
        (tile_mean - mean[None, :]) ** 2, axis=0)
    var = m2 / total                                    # biased var (training BN)
    inv_std = lax.rsqrt(var + BN_EPS)
    scale = gamma.astype(jnp.float32) * inv_std         # (Cout,)
    bias = beta.astype(jnp.float32) - mean * scale
    scale_c = scale[:, None]                            # (Cout, 1)
    bias_c = bias[:, None]
    # TODO(synk): training-mode BatchNorm2d also updates running_mean /
    # running_var (unbiased variance); those side-effect buffers are not
    # produced here.

    # ---- pass 2: y = max(conv * scale + bias, 0), written in NCHW layout ----
    y_flat = pl.pallas_call(
        bn_relu_kernel,
        out_shape=jax.ShapeDtypeStruct((n, cout, s), jnp.float32),
        grid=(n,),
        in_specs=[
            pl.BlockSpec((cout, 1), lambda b: (0, 0)),
            pl.BlockSpec((cout, 1), lambda b: (0, 0)),
            pl.BlockSpec((None, cout, s), lambda b: (b, 0, 0)),
        ],
        out_specs=pl.BlockSpec((None, cout, s), lambda b: (b, 0, 0)),
        compiler_params=pltpu.CompilerParams(
            dimension_semantics=("parallel",)),
    )(scale_c, bias_c, conv_t)

    return y_flat.reshape(n, cout, oh, ow)              # free reshape, no transpose


if __name__ == "__main__":
    key = jax.random.PRNGKey(0)
    k_x, k_w = jax.random.split(key)

    # ConvBlock(input_dim=4, output_dim=8, kernel_size=3, stride=1, padding=1)
    N, Cin, H, W = 2, 4, 16, 16
    Cout, KH, KW = 8, 3, 3
    stride, padding = 1, 1

    x = jax.random.normal(k_x, (N, Cin, H, W), dtype=jnp.float32)
    # Conv2d weight (bias=False since include_batch_relu=True).
    weight = jax.random.normal(k_w, (Cout, Cin, KH, KW), dtype=jnp.float32) * 0.1
    # BatchNorm2d default init: gamma=1, beta=0.
    gamma = jnp.ones((Cout,), dtype=jnp.float32)
    beta = jnp.zeros((Cout,), dtype=jnp.float32)

    out = conv_block_forward(x, weight, gamma, beta,
                             stride=stride, padding=padding)
    out = jax.block_until_ready(out)

    # Reference: f32 conv + training-mode BN + ReLU (tolerance covers bf16 MXU
    # inputs and the bf16 conv intermediate).
    conv_ref = lax.conv_general_dilated(
        x, weight, (stride, stride),
        [(padding, padding), (padding, padding)],
        dimension_numbers=("NCHW", "OIHW", "NCHW"))
    mu = conv_ref.mean(axis=(0, 2, 3), keepdims=True)
    vv = conv_ref.var(axis=(0, 2, 3), keepdims=True)
    ref = jnp.maximum((conv_ref - mu) * lax.rsqrt(vv + BN_EPS)
                      * gamma.reshape(1, -1, 1, 1) + beta.reshape(1, -1, 1, 1),
                      0.0)

    assert out.shape == (N, Cout, H, W), out.shape
    assert bool(jnp.all(out >= 0.0))                     # ReLU sanity
    max_err = float(jnp.max(jnp.abs(out - ref)))
    assert max_err < 0.15, f"max_err={max_err}"
    print("KERNEL_OK")
</pallas_src>

<mosaic_0001>
module attributes {stable_mosaic.version = 11 : i64} {
  func.func @conv_stats_kernel(%arg0: i32, %arg1: memref<1x4x18x18xbf16, #tpu.memory_space<vmem>>, %arg2: memref<9x8x4xbf16, #tpu.memory_space<vmem>>, %arg3: memref<1x8x256xbf16, #tpu.memory_space<vmem>>, %arg4: memref<1x1x8xf32, #tpu.memory_space<vmem>>, %arg5: memref<1x1x8xf32, #tpu.memory_space<vmem>>) attributes {dimension_semantics = [#tpu.dimension_semantics<parallel>], iteration_bounds = array<i64: 2>, scalar_prefetch = 0 : i64, scratch_operands = 0 : i64, tpu.core_type = #tpu.core_type<tc>, window_params = [{transform_indices = @transform_0, window_bounds = array<i64: 1, 4, 18, 18>}, {pipeline_mode = #tpu.pipeline_mode<synchronous>, transform_indices = @transform_1, window_bounds = array<i64: 9, 8, 4>}, {transform_indices = @transform_2, window_bounds = array<i64: 1, 8, 256>}, {transform_indices = @transform_3, window_bounds = array<i64: 1, 1, 8>}, {transform_indices = @transform_4, window_bounds = array<i64: 1, 1, 8>}]} {
    %c0 = arith.constant 0 : index
    %c0_0 = arith.constant 0 : index
    %c0_1 = arith.constant 0 : index
    %c0_2 = arith.constant 0 : index
    %0 = vector.load %arg1[%c0, %c0_0, %c0_1, %c0_2] : memref<1x4x18x18xbf16, #tpu.memory_space<vmem>>, vector<1x4x18x18xbf16>
    %1 = vector.shape_cast %0 : vector<1x4x18x18xbf16> to vector<4x18x18xbf16>
    %cst = arith.constant 0.000000e+00 : f32
    %2 = vector.broadcast %cst : f32 to vector<8x256xf32>
    %3 = vector.extract_strided_slice %1 {offsets = [0, 0, 0], sizes = [4, 16, 16], strides = [1, 1, 1]} : vector<4x18x18xbf16> to vector<4x16x16xbf16>
    %4 = vector.shape_cast %3 : vector<4x16x16xbf16> to vector<4x256xbf16>
    %c0_3 = arith.constant 0 : index
    %c0_4 = arith.constant 0 : index
    %c0_5 = arith.constant 0 : index
    %5 = vector.load %arg2[%c0_3, %c0_4, %c0_5] : memref<9x8x4xbf16, #tpu.memory_space<vmem>>, vector<1x8x4xbf16>
    %6 = vector.shape_cast %5 : vector<1x8x4xbf16> to vector<8x4xbf16>
    %cst_6 = arith.constant dense<0.000000e+00> : vector<8x256xf32>
    %7 = tpu.matmul %6, %4, %cst_6 {dimension_numbers = #tpu.dot_dimension_numbers<[1], [0], [0], [1], [0, 0, 1, 1], [], []>} : vector<8x4xbf16>, vector<4x256xbf16>, vector<8x256xf32> -> vector<8x256xf32>
    %8 = arith.addf %2, %7 : vector<8x256xf32>
    %9 = vector.extract_strided_slice %1 {offsets = [0, 0, 1], sizes = [4, 16, 16], strides = [1, 1, 1]} : vector<4x18x18xbf16> to vector<4x16x16xbf16>
    %10 = vector.shape_cast %9 : vector<4x16x16xbf16> to vector<4x256xbf16>
    %c1 = arith.constant 1 : index
    %c0_7 = arith.constant 0 : index
    %c0_8 = arith.constant 0 : index
    %11 = vector.load %arg2[%c1, %c0_7, %c0_8] : memref<9x8x4xbf16, #tpu.memory_space<vmem>>, vector<1x8x4xbf16>
    %12 = vector.shape_cast %11 : vector<1x8x4xbf16> to vector<8x4xbf16>
    %cst_9 = arith.constant dense<0.000000e+00> : vector<8x256xf32>
    %13 = tpu.matmul %12, %10, %cst_9 {dimension_numbers = #tpu.dot_dimension_numbers<[1], [0], [0], [1], [0, 0, 1, 1], [], []>} : vector<8x4xbf16>, vector<4x256xbf16>, vector<8x256xf32> -> vector<8x256xf32>
    %14 = arith.addf %8, %13 : vector<8x256xf32>
    %15 = vector.extract_strided_slice %1 {offsets = [0, 0, 2], sizes = [4, 16, 16], strides = [1, 1, 1]} : vector<4x18x18xbf16> to vector<4x16x16xbf16>
    %16 = vector.shape_cast %15 : vector<4x16x16xbf16> to vector<4x256xbf16>
    %c2 = arith.constant 2 : index
    %c0_10 = arith.constant 0 : index
    %c0_11 = arith.constant 0 : index
    %17 = vector.load %arg2[%c2, %c0_10, %c0_11] : memref<9x8x4xbf16, #tpu.memory_space<vmem>>, vector<1x8x4xbf16>
    %18 = vector.shape_cast %17 : vector<1x8x4xbf16> to vector<8x4xbf16>
    %cst_12 = arith.constant dense<0.000000e+00> : vector<8x256xf32>
    %19 = tpu.matmul %18, %16, %cst_12 {dimension_numbers = #tpu.dot_dimension_numbers<[1], [0], [0], [1], [0, 0, 1, 1], [], []>} : vector<8x4xbf16>, vector<4x256xbf16>, vector<8x256xf32> -> vector<8x256xf32>
    %20 = arith.addf %14, %19 : vector<8x256xf32>
    %21 = vector.extract_strided_slice %1 {offsets = [0, 1, 0], sizes = [4, 16, 16], strides = [1, 1, 1]} : vector<4x18x18xbf16> to vector<4x16x16xbf16>
    %22 = vector.shape_cast %21 : vector<4x16x16xbf16> to vector<4x256xbf16>
    %c3 = arith.constant 3 : index
    %c0_13 = arith.constant 0 : index
    %c0_14 = arith.constant 0 : index
    %23 = vector.load %arg2[%c3, %c0_13, %c0_14] : memref<9x8x4xbf16, #tpu.memory_space<vmem>>, vector<1x8x4xbf16>
    %24 = vector.shape_cast %23 : vector<1x8x4xbf16> to vector<8x4xbf16>
    %cst_15 = arith.constant dense<0.000000e+00> : vector<8x256xf32>
    %25 = tpu.matmul %24, %22, %cst_15 {dimension_numbers = #tpu.dot_dimension_numbers<[1], [0], [0], [1], [0, 0, 1, 1], [], []>} : vector<8x4xbf16>, vector<4x256xbf16>, vector<8x256xf32> -> vector<8x256xf32>
    %26 = arith.addf %20, %25 : vector<8x256xf32>
    %27 = vector.extract_strided_slice %1 {offsets = [0, 1, 1], sizes = [4, 16, 16], strides = [1, 1, 1]} : vector<4x18x18xbf16> to vector<4x16x16xbf16>
    %28 = vector.shape_cast %27 : vector<4x16x16xbf16> to vector<4x256xbf16>
    %c4 = arith.constant 4 : index
    %c0_16 = arith.constant 0 : index
    %c0_17 = arith.constant 0 : index
    %29 = vector.load %arg2[%c4, %c0_16, %c0_17] : memref<9x8x4xbf16, #tpu.memory_space<vmem>>, vector<1x8x4xbf16>
    %30 = vector.shape_cast %29 : vector<1x8x4xbf16> to vector<8x4xbf16>
    %cst_18 = arith.constant dense<0.000000e+00> : vector<8x256xf32>
    %31 = tpu.matmul %30, %28, %cst_18 {dimension_numbers = #tpu.dot_dimension_numbers<[1], [0], [0], [1], [0, 0, 1, 1], [], []>} : vector<8x4xbf16>, vector<4x256xbf16>, vector<8x256xf32> -> vector<8x256xf32>
    %32 = arith.addf %26, %31 : vector<8x256xf32>
    %33 = vector.extract_strided_slice %1 {offsets = [0, 1, 2], sizes = [4, 16, 16], strides = [1, 1, 1]} : vector<4x18x18xbf16> to vector<4x16x16xbf16>
    %34 = vector.shape_cast %33 : vector<4x16x16xbf16> to vector<4x256xbf16>
    %c5 = arith.constant 5 : index
    %c0_19 = arith.constant 0 : index
    %c0_20 = arith.constant 0 : index
    %35 = vector.load %arg2[%c5, %c0_19, %c0_20] : memref<9x8x4xbf16, #tpu.memory_space<vmem>>, vector<1x8x4xbf16>
    %36 = vector.shape_cast %35 : vector<1x8x4xbf16> to vector<8x4xbf16>
    %cst_21 = arith.constant dense<0.000000e+00> : vector<8x256xf32>
    %37 = tpu.matmul %36, %34, %cst_21 {dimension_numbers = #tpu.dot_dimension_numbers<[1], [0], [0], [1], [0, 0, 1, 1], [], []>} : vector<8x4xbf16>, vector<4x256xbf16>, vector<8x256xf32> -> vector<8x256xf32>
    %38 = arith.addf %32, %37 : vector<8x256xf32>
    %39 = vector.extract_strided_slice %1 {offsets = [0, 2, 0], sizes = [4, 16, 16], strides = [1, 1, 1]} : vector<4x18x18xbf16> to vector<4x16x16xbf16>
    %40 = vector.shape_cast %39 : vector<4x16x16xbf16> to vector<4x256xbf16>
    %c6 = arith.constant 6 : index
    %c0_22 = arith.constant 0 : index
    %c0_23 = arith.constant 0 : index
    %41 = vector.load %arg2[%c6, %c0_22, %c0_23] : memref<9x8x4xbf16, #tpu.memory_space<vmem>>, vector<1x8x4xbf16>
    %42 = vector.shape_cast %41 : vector<1x8x4xbf16> to vector<8x4xbf16>
    %cst_24 = arith.constant dense<0.000000e+00> : vector<8x256xf32>
    %43 = tpu.matmul %42, %40, %cst_24 {dimension_numbers = #tpu.dot_dimension_numbers<[1], [0], [0], [1], [0, 0, 1, 1], [], []>} : vector<8x4xbf16>, vector<4x256xbf16>, vector<8x256xf32> -> vector<8x256xf32>
    %44 = arith.addf %38, %43 : vector<8x256xf32>
    %45 = vector.extract_strided_slice %1 {offsets = [0, 2, 1], sizes = [4, 16, 16], strides = [1, 1, 1]} : vector<4x18x18xbf16> to vector<4x16x16xbf16>
    %46 = vector.shape_cast %45 : vector<4x16x16xbf16> to vector<4x256xbf16>
    %c7 = arith.constant 7 : index
    %c0_25 = arith.constant 0 : index
    %c0_26 = arith.constant 0 : index
    %47 = vector.load %arg2[%c7, %c0_25, %c0_26] : memref<9x8x4xbf16, #tpu.memory_space<vmem>>, vector<1x8x4xbf16>
    %48 = vector.shape_cast %47 : vector<1x8x4xbf16> to vector<8x4xbf16>
    %cst_27 = arith.constant dense<0.000000e+00> : vector<8x256xf32>
    %49 = tpu.matmul %48, %46, %cst_27 {dimension_numbers = #tpu.dot_dimension_numbers<[1], [0], [0], [1], [0, 0, 1, 1], [], []>} : vector<8x4xbf16>, vector<4x256xbf16>, vector<8x256xf32> -> vector<8x256xf32>
    %50 = arith.addf %44, %49 : vector<8x256xf32>
    %51 = vector.extract_strided_slice %1 {offsets = [0, 2, 2], sizes = [4, 16, 16], strides = [1, 1, 1]} : vector<4x18x18xbf16> to vector<4x16x16xbf16>
    %52 = vector.shape_cast %51 : vector<4x16x16xbf16> to vector<4x256xbf16>
    %c8 = arith.constant 8 : index
    %c0_28 = arith.constant 0 : index
    %c0_29 = arith.constant 0 : index
    %53 = vector.load %arg2[%c8, %c0_28, %c0_29] : memref<9x8x4xbf16, #tpu.memory_space<vmem>>, vector<1x8x4xbf16>
    %54 = vector.shape_cast %53 : vector<1x8x4xbf16> to vector<8x4xbf16>
    %cst_30 = arith.constant dense<0.000000e+00> : vector<8x256xf32>
    %55 = tpu.matmul %54, %52, %cst_30 {dimension_numbers = #tpu.dot_dimension_numbers<[1], [0], [0], [1], [0, 0, 1, 1], [], []>} : vector<8x4xbf16>, vector<4x256xbf16>, vector<8x256xf32> -> vector<8x256xf32>
    %56 = arith.addf %50, %55 : vector<8x256xf32>
    %57 = arith.truncf %56 : vector<8x256xf32> to vector<8x256xbf16>
    %c0_31 = arith.constant 0 : index
    %c0_32 = arith.constant 0 : index
    %c0_33 = arith.constant 0 : index
    %58 = vector.load %arg3[%c0_31, %c0_32, %c0_33] : memref<1x8x256xbf16, #tpu.memory_space<vmem>>, vector<1x8x256xbf16>
    %59 = vector.shape_cast %58 : vector<1x8x256xbf16> to vector<8x256xbf16>
    %60 = vector.shape_cast %57 : vector<8x256xbf16> to vector<1x8x256xbf16>
    tpu.vector_store %arg3[%c0_31, %c0_32, %c0_33], %60 {strides = array<i32>} : memref<1x8x256xbf16, #tpu.memory_space<vmem>>, vector<1x8x256xbf16>,
    %cst_34 = arith.constant dense<0.000000e+00> : vector<8xf32>
    %61 = vector.multi_reduction <add>, %56, %cst_34 [1] : vector<8x256xf32> to vector<8xf32>
    %cst_35 = arith.constant 3.906250e-03 : f32
    %62 = vector.broadcast %cst_35 : f32 to vector<8xf32>
    %63 = arith.mulf %61, %62 : vector<8xf32>
    %64 = vector.shape_cast %63 : vector<8xf32> to vector<8x1xf32>
    %65 = vector.broadcast %64 : vector<8x1xf32> to vector<8x256xf32>
    %66 = arith.subf %56, %65 : vector<8x256xf32>
    %67 = arith.mulf %66, %66 : vector<8x256xf32>
    %cst_36 = arith.constant dense<0.000000e+00> : vector<8xf32>
    %68 = vector.multi_reduction <add>, %67, %cst_36 [1] : vector<8x256xf32> to vector<8xf32>
    %69 = vector.shape_cast %61 : vector<8xf32> to vector<1x8xf32>
    %c0_37 = arith.constant 0 : index
    %c0_38 = arith.constant 0 : index
    %c0_39 = arith.constant 0 : index
    %70 = vector.load %arg4[%c0_37, %c0_38, %c0_39] : memref<1x1x8xf32, #tpu.memory_space<vmem>>, vector<1x1x8xf32>
    %71 = vector.shape_cast %70 : vector<1x1x8xf32> to vector<1x8xf32>
    %72 = vector.shape_cast %69 : vector<1x8xf32> to vector<1x1x8xf32>
    tpu.vector_store %arg4[%c0_37, %c0_38, %c0_39], %72 {strides = array<i32>} : memref<1x1x8xf32, #tpu.memory_space<vmem>>, vector<1x1x8xf32>,
    %73 = vector.shape_cast %68 : vector<8xf32> to vector<1x8xf32>
    %c0_40 = arith.constant 0 : index
    %c0_41 = arith.constant 0 : index
    %c0_42 = arith.constant 0 : index
    %74 = vector.load %arg5[%c0_40, %c0_41, %c0_42] : memref<1x1x8xf32, #tpu.memory_space<vmem>>, vector<1x1x8xf32>
    %75 = vector.shape_cast %74 : vector<1x1x8xf32> to vector<1x8xf32>
    %76 = vector.shape_cast %73 : vector<1x8xf32> to vector<1x1x8xf32>
    tpu.vector_store %arg5[%c0_40, %c0_41, %c0_42], %76 {strides = array<i32>} : memref<1x1x8xf32, #tpu.memory_space<vmem>>, vector<1x1x8xf32>,
    return
  }
  func.func @transform_0(%arg0: i32) -> (i32, i32, i32, i32) {
    %c0_i32 = arith.constant 0 : i32
    %c0_i32_0 = arith.constant 0 : i32
    %c0_i32_1 = arith.constant 0 : i32
    %c0_i32_2 = arith.constant 0 : i32
    return %arg0, %c0_i32, %c0_i32_0, %c0_i32_1 : i32, i32, i32, i32
  }
  func.func @transform_1(%arg0: i32) -> (i32, i32, i32) {
    %c0_i32 = arith.constant 0 : i32
    %c0_i32_0 = arith.constant 0 : i32
    %c0_i32_1 = arith.constant 0 : i32
    %c0_i32_2 = arith.constant 0 : i32
    return %c0_i32, %c0_i32_0, %c0_i32_1 : i32, i32, i32
  }
  func.func @transform_2(%arg0: i32) -> (i32, i32, i32) {
    %c0_i32 = arith.constant 0 : i32
    %c0_i32_0 = arith.constant 0 : i32
    %c0_i32_1 = arith.constant 0 : i32
    return %arg0, %c0_i32, %c0_i32_0 : i32, i32, i32
  }
  func.func @transform_3(%arg0: i32) -> (i32, i32, i32) {
    %c0_i32 = arith.constant 0 : i32
    %c0_i32_0 = arith.constant 0 : i32
    %c0_i32_1 = arith.constant 0 : i32
    return %arg0, %c0_i32, %c0_i32_0 : i32, i32, i32
  }
  func.func @transform_4(%arg0: i32) -> (i32, i32, i32) {
    %c0_i32 = arith.constant 0 : i32
    %c0_i32_0 = arith.constant 0 : i32
    %c0_i32_1 = arith.constant 0 : i32
    return %arg0, %c0_i32, %c0_i32_0 : i32, i32, i32
  }
}

</mosaic_0001>

<bundles_post_ra>
// kernel: tpu_custom_call.1
= control target key start
LH: loop header
LB: loop body
LE: loop exit
PB: predicated region body
PF: predicated region fallthrough
CT: control target
= control target key end

     0   :  { %10 = vsyncpa [#allocation3], 0  ;;  %s4847_s0 = inlined_call_operand.vmem [shape: bf16[2,4,18,18], index: 0, kind: input, shape index: {}]   ;;  %s4848_s1 = inlined_call_operand.vmem [shape: bf16[9,8,4], index: 1, kind: input, shape index: {}]   ;;  %s4849_s2 = inlined_call_operand.hbm [shape: bf16[2,8,256], index: 2, kind: output, shape index: {0}]   ;;  %s4850_s3 = inlined_call_operand.hbm [shape: f32[2,1,8], index: 3, kind: output, shape index: {1}]   ;;  %s4851_s4 = inlined_call_operand.hbm [shape: f32[2,1,8], index: 4, kind: output, shape index: {2}]  }
   0x1   :  { %12 = vsyncpa [#allocation3 + $0x1], 0 }
   0x2   :  { %13 = vsyncpa [#allocation5], 0 }
   0x3   :  { %15 = vsyncpa [#allocation5 + $0x1], 0  ;;  %s3291_s15 = smov 0   ;;  %s3293_s16 = smov 0  }
   0x4   :  { %s3295_s17 = smov 0   ;;  %s3297_s18 = smov 0  }
   0x5 LB: > { %s3312_s19 = sadd.s32 4294967295, %s3253_s18   ;;  %s3024_s20 = sadd.s32 4294967294, %s3253_s18   ;;  %s3253_s18 = sphi %s3297_s18, %s4861_s18   ;;  %s3249_s17 = sphi %s3295_s17, %s4860_s17   ;;  %s3245_s16 = sphi %s3293_s16, %s4859_s16   ;;  %s3241_s15 = sphi %s3291_s15, %s4858_s15  }
   0x6   : > { %s3316_s21 = sadd.s32 1, %s3253_s18   ;;  %s75_s22 = sadd.s32 1, %s3249_s17 }
   0x7   : > { %s72_s23 = ssub.s32 %s3253_s18, %s3316_s21  ;;  %p85_p0 = scmp.ne.s32.totalorder %s3249_s17, %s3245_s16 }
   0x8   : > { %p73_p1 = scmp.eq.s32.totalorder %s72_s23, 0  ;;  %p86_p2 = scmp.eq.s32.totalorder %s3312_s19, 1 }
   0x9   : > { %p91_p3 = scmp.ne.s32.totalorder %s3245_s16, %s3241_s15  ;;  %p92_p4 = scmp.eq.s32.totalorder %s3024_s20, 1 }
   0xa   : > { %s3329_s24 = scalar_select %p73_p1, %s3249_s17, %s75_s22  }
   0xb   : > { %p3331_p5 = por %p86_p2, %p85_p0  ;;  %p3335_p6 = por %p92_p4, %p91_p3 }
   0xc   : > { %p3027_p7 = scmp.ge.s32.totalorder %s3253_s18, 1  ;;  %p173_p8 = scmp.lt.s32.totalorder %s3253_s18, 3 }
   0xe   : > { %p174_p9 = pnand %p3027_p7, %p173_p8 }
   0xf   : > { %p207_p10 = scmp.lt.s32.totalorder (!%p174_p9), %s3312_s19, 1  ;;  %s3257_s6 = smov (!%p174_p9), 64  }
  0x10   : > { %177 = sbr.rel (%p174_p9) target bundleno = 1141 (0x475), region = 28  ;;  %s3258_s7 = smov (!%p174_p9), 16  }
  0x11   : > { %s3259_s8 = smov (!%p174_p9), 80   ;;  %s3260_s9 = smov (!%p174_p9), 32  }
  0x12   : > { %s3261_s10 = smov (!%p174_p9), 112   ;;  %s3262_s11 = smov (!%p174_p9), 96  }
  0x13   : > { %s3263_s12 = smov (!%p174_p9), 48   ;;  %s3264_s13 = smov (!%p174_p9), 127  }
  0x14   : > { %s3265_s14 = smov (!%p174_p9), 126   ;;  %s2866_s30 = sand.u32 (!%p174_p9), 1, %s3312_s19  }
  0x15   : > { %s208_s27 = scalar_select %p207_p10, %s3312_s19, 1  ;;  %v3255_v0 = vmov 1983009808   ;;  %v3256_v6 = vmov 1934713408   ;;  %vm260_vm0 = vcmask 1047556  }
  0x16   : > { %v251_v1 = vunpack.c.l.s4 %v3255_v0  ;;  %v265_v7 = vunpack.c.l.s4 %v3256_v6  ;;  %vm424_vm1 = vcmask 130048   ;;  %vm428_vm2 = vcmask 261120  }
  0x17   : > { %s3066_s28 = smul.u32 48, %s208_s27  ;;  %vm431_vm3 = vcmask 392192   ;;  %vm434_vm4 = vcmask 523264   ;;  %vm437_vm5 = vcmask 654336   ;;  %vm440_vm6 = vcmask 785408   ;;  %s4769_s27 = sand.u32 1, %s3245_s16  }
  0x18   : > { %v3348_v2 = vunpack.c.0.s8 %v251_v1  ;;  %v3376_v18 = vunpack.c.0.s8 %v265_v7  ;;  %vm443_vm7 = vcmask 916480   ;;  %vm720_vm8 = vcmask 1041408  }
  0x19   : > { %s3346_s5 = scalar_lea.vmem %s4847_s0, %s3066_s28  ;;  %vm1065_vm9 = vsmask.f32 3328  ;;  %vm1066_vm10 = vsmask.f32 7440  ;;  %vm1979_vm12 = vcmask 1042432   ;;  %vm1980_vm13 = vcmask 1046532  }
  0x1a   : > { %v3351_v3 = vld [vmem:[%s3346_s5] sm:$0xf]  ;;  %v3354_v4 = vld [vmem:[%s3346_s5 + $0xc] sm:$0xf]  ;;  %v3357_v5 = vld [vmem:[%s3346_s5 + $0x18] sm:$0xf] }
  0x1b   : > { %v3360_v8 = vld [vmem:[%s3346_s5 + $0x24] sm:$0xf]  ;;  %v227_v9 = vpack.i.b16 %v3354_v4, %v3351_v3  ;;  %v228_v10 = vshrl.u32 %v3351_v3, 16  ;;  %v229_v11 = vshrl.u32 %v3354_v4, 16  ;;  %v234_v12 = vshrl.u32 %v3357_v5, 16  ;;  %vm3673_vm11 = vmor %vm1065_vm9, %vm1066_vm10  ;;  %s3028_s28 = sshll.u32 %s4769_s27, 3 }
  0x1c   : > { %v233_v13 = vpack.i.b16 %v3360_v8, %v3357_v5  ;;  %v235_v14 = vshrl.u32 %v3360_v8, 16  ;;  %v3385_v23 = vld [vmem:[%s3346_s5 + $0x4] sm:$0xf]  ;;  %v3388_v24 = vld [vmem:[%s3346_s5 + $0x10] sm:$0xf]  ;;  %vm3840_vm14 = vmor %vm1979_vm12, %vm1980_vm13  ;;  %vm716_vm15 = vcmask 31744  }
  0x1d   : > { %v253_v15 = vperm.slane %v227_v9, %v3348_v2  ;;  %v230_v16 = vpack.i.b16 %v229_v11, %v228_v10  ;;  %v3392_v26 = vld [vmem:[%s3346_s5 + $0x1c] sm:$0xf]  ;;  %v3398_v30 = vld [vmem:[%s3346_s5 + $0x28] sm:$0xf]  ;;  %v240_v31 = vshrl.u32 %v3385_v23, 16  ;;  %v241_v32 = vshrl.u32 %v3388_v24, 16 }
  0x1e   : > { %v258_v17 = vperm.slane %v233_v13, %v3348_v2  ;;  %v236_v19 = vpack.i.b16 %v235_v14, %v234_v12  ;;  %v246_v35 = vshrl.u32 %v3392_v26, 16  ;;  %v247_v40 = vshrl.u32 %v3398_v30, 16  ;;  %s4772_s29 = scalar_lea.vmem [#allocation2], %s3028_s28 }
  0x1f   : > { %v262_v20 = vrot.slane %v253_v15, 4  ;;  %v280_v21 = vperm.slane %v230_v16, %v3348_v2  ;;  %v242_v38 = vpack.i.b16 %v241_v32, %v240_v31  ;;  %v239_v42 = vpack.i.b16 %v3388_v24, %v3385_v23 }
  0x20   : > { %v285_v22 = vperm.slane %v236_v19, %v3348_v2  ;;  %v259_v27 = vrot.slane %v258_v17, 4  ;;  %v248_v45 = vpack.i.b16 %v247_v40, %v246_v35  ;;  %v245_v47 = vpack.i.b16 %v3398_v30, %v3392_v26 }
  0x21   : > { %v263_v25 = vsel %vm260_vm0, %v258_v17, %v262_v20  ;;  %v288_v36 = vrot.slane %v280_v21, 4  ;;  %v332_v44 = vperm.slane %v242_v38, %v3348_v2  ;;  %v306_v48 = vperm.slane %v239_v42, %v3348_v2 }
  0x22   : > { %v3395_v28 = vperm.slane %v263_v25, %v3376_v18  ;;  %v286_v29 = vrot.slane %v285_v22, 4  ;;  %v261_v41 = vsel %vm260_vm0, %v259_v27, %v253_v15  ;;  %v337_v52 = vperm.slane %v248_v45, %v3348_v2 }
  0x23   : > { %v3421_v46 = vperm.slane %v261_v41, %v3376_v18  ;;  %v340_v50 = vrot.slane %v332_v44, 4  ;;  %v289_v51 = vsel %vm260_vm0, %v285_v22, %v288_v36  ;;  %v311_v54 = vperm.slane %v245_v47, %v3348_v2 }
  0x24   : > { %v370_v33 = vunpack.c.l.b16 %v3395_v28  ;;  %v287_v34 = vsel %vm260_vm0, %v286_v29, %v280_v21  ;;  %v314_v55 = vrot.slane %v306_v48, 4  ;;  %v297_v56 = vperm.slane %v289_v51, %v3376_v18 }
  0x25   : > { %v293_v37 = vperm.slane %v287_v34, %v3376_v18  ;;  %v272_v53 = vrot.slane %v3421_v46, 4  ;;  %v338_v57 = vrot.slane %v337_v52, 4  ;;  %v341_v0 = vsel %vm260_vm0, %v337_v52, %v340_v50 }
  0x26   : > { %v371_v39 = vpack.c.b16 %v370_v33, %v370_v33  ;;  %v300_v60 = vrot.slane %v297_v56, 4  ;;  %v315_v62 = vsel %vm260_vm0, %v311_v54, %v314_v55  ;;  %v375_v63 = vunpack.c.l.b16 %v297_v56 }
  0x27   : > { %v355_v43 = vunpack.c.l.b16 %v293_v37  ;;  %v273_v58 = vsel %vm260_vm0, 0, %v272_v53  ;;  %v339_v61 = vsel %vm260_vm0, %v338_v57, %v332_v44  ;;  %v349_v13 = vperm.slane %v341_v0, %v3376_v18 }
  0x28   : > { %372 = vrot.lane.b32.xlu1 %v371_v39, %s3257_s6  ;;  %v360_v59 = vunpack.c.l.b16 %v273_v58  ;;  %v345_v1 = vperm.slane %v339_v61, %v3376_v18  ;;  %v301_v7 = vsel %vm260_vm0, 0, %v300_v60  ;;  %v376_v9 = vpack.c.b16 %v375_v63, %v375_v63 }
  0x29   : > { %v356_v49 = vpack.c.b16 %v355_v43, %v355_v43  ;;  %v312_v16 = vrot.slane %v311_v54, 4  ;;  %v323_v17 = vperm.slane %v315_v62, %v3376_v18  ;;  %v410_v19 = vunpack.c.l.b16 %v349_v13 }
  0x2a   : > { %v361_v6 = vpack.c.b16 %v360_v59, %v360_v59  ;;  %v390_v15 = vunpack.c.l.b16 %v345_v1  ;;  %377 = vrot.lane.b32.xlu2 %v376_v9, %s3259_s8  ;;  %v274_v20 = vrot.slane %v3395_v28, 4  ;;  %v385_v22 = vunpack.c.l.b16 %v301_v7 }
  0x2b   : > { %357 = vrot.lane.b32.xlu0 %v356_v49, %s3258_s7  ;;  %v350_v25 = vrot.slane %v345_v1, 4  ;;  %v405_v27 = vunpack.c.l.b16 %v323_v17  ;;  %v313_v29 = vsel %vm260_vm0, %v312_v16, %v306_v48  ;;  %v298_v33 = vrot.slane %v293_v37, 4 }
  0x2c   : > { %v391_v21 = vpack.c.b16 %v390_v15, %v390_v15  ;;  %v411_v34 = vpack.c.b16 %v410_v19, %v410_v19  ;;  %v386_v36 = vpack.c.b16 %v385_v22, %v385_v22  ;;  %v275_v38 = vsel %vm260_vm0, 0, %v274_v20 }
  0x2d   : > { %v3447_v39 = vperm.slane %v313_v29, %v3376_v18  ;;  %v351_v28 = vsel %vm260_vm0, 0, %v350_v25  ;;  %v406_v41 = vpack.c.b16 %v405_v27, %v405_v27  ;;  %v299_v42 = vsel %vm260_vm0, 0, %v298_v33 }
  0x2e   : > { %v380_v43 = vunpack.c.l.b16 %v275_v38  ;;  %v400_v44 = vunpack.c.l.b16 %v351_v28  ;;  %v326_v45 = vrot.slane %v323_v17, 4  ;;  %v365_v47 = vunpack.c.l.b16 %v299_v42 }
  0x2f   : > { %v324_v37 = vrot.slane %v3447_v39, 4  ;;  %v352_v48 = vrot.slane %v349_v13, 4 }
  0x30   : > { %392 = vrot.lane.b32.xlu1 %v391_v21, %s3258_s7  ;;  %v381_v49 = vpack.c.b16 %v380_v43, %v380_v43  ;;  %v401_v50 = vpack.c.b16 %v400_v44, %v400_v44  ;;  %v327_v52 = vsel %vm260_vm0, 0, %v326_v45  ;;  %v366_v53 = vpack.c.b16 %v365_v47, %v365_v47 }
  0x31   : > { %v325_v51 = vsel %vm260_vm0, 0, %v324_v37  ;;  %v353_v54 = vsel %vm260_vm0, 0, %v352_v48  ;;  %v415_v56 = vunpack.c.l.b16 %v327_v52 }
  0x32   : > { %412 = vrot.lane.b32.xlu2 %v411_v34, %s3259_s8  ;;  %v395_v55 = vunpack.c.l.b16 %v325_v51  ;;  %v420_v57 = vunpack.c.l.b16 %v353_v54 }
  0x33   : > { %362 = vrot.lane.b32.xlu0 %v361_v6, %s3260_s9  ;;  %v416_v59 = vpack.c.b16 %v415_v56, %v415_v56 }
  0x34   : > { %v396_v58 = vpack.c.b16 %v395_v55, %v395_v55  ;;  %v421_v60 = vpack.c.b16 %v420_v57, %v420_v57 }
  0x38   : > { %407 = vrot.lane.b32.xlu1 %v406_v41, %s3257_s6 }
  0x3a   : > { %382 = vrot.lane.b32.xlu2 %v381_v49, %s3262_s11 }
  0x3b   : > { %387 = vrot.lane.b32.xlu0 %v386_v36, %s3261_s10 }
  0x40   : > { %367 = vrot.lane.b32.xlu1 %v366_v53, %s3263_s12 }
  0x42   : > { %397 = vrot.lane.b32.xlu2 %v396_v58, %s3260_s9 }
  0x43   : > { %402 = vrot.lane.b32.xlu0 %v401_v50, %s3263_s12 }
  0x48   : > { %422 = vrot.lane.b32.xlu1 %v421_v60, %s3261_s10 }
  0x4a   : > { %470 = vrot.lane.b32.xlu2 %v3351_v3, %s3264_s13 }
  0x4b   : > { %417 = vrot.lane.b32.xlu0 %v416_v59, %s3262_s11 }
  0x50   : > { %474 = vrot.lane.b32.xlu1 %v3354_v4, %s3264_s13 }
  0x52   : > { %476 = vrot.lane.b32.xlu2 %v3388_v24, %s3264_s13 }
  0x53   : > { %472 = vrot.lane.b32.xlu0 %v3385_v23, %s3264_s13 }
  0x58   : > { %480 = vrot.lane.b32.xlu1 %v3392_v26, %s3264_s13 }
  0x5a   : > { %482 = vrot.lane.b32.xlu2 %v3360_v8, %s3264_s13 }
  0x5b   : > { %478 = vrot.lane.b32.xlu0 %v3357_v5, %s3264_s13 }
  0x60   : > { %786 = vrot.lane.b32.xlu1 %v3385_v23, %s3265_s14 }
  0x62   : > { %788 = vrot.lane.b32.xlu2 %v3354_v4, %s3265_s14 }
  0x63   : > { %484 = vrot.lane.b32.xlu0 %v3398_v30, %s3264_s13 }
  0x68   : > { %792 = vrot.lane.b32.xlu1 %v3357_v5, %s3265_s14 }
  0x6a   : > { %794 = vrot.lane.b32.xlu2 %v3392_v26, %s3265_s14 }
  0x6b   : > { %784 = vrot.lane.b32.xlu0 %v3351_v3, %s3265_s14 }
  0x70   : > { %798 = vrot.lane.b32.xlu1 %v3398_v30, %s3265_s14 }
  0x73   : > { %790 = vrot.lane.b32.xlu0 %v3388_v24, %s3265_s14 }
  0x7b   : > { %796 = vrot.lane.b32.xlu0 %v3360_v8, %s3265_s14 }
  0x84   : > { %v378_v61 = vpop.permute.xlu2 %377 }
  0x8c   : > { %v413_v62 = vpop.permute.xlu2 %412 }
  0x94   : > { %v383_v1 = vpop.permute.xlu2 %382 }
  0x9a   : > { %v373_v63 = vpop.permute.xlu1 %372 }
  0x9c   : > { %v398_v9 = vpop.permute.xlu2 %397 }
  0x9d   : > { %v358_v0 = vpop.permute.xlu0 %357 }
  0x9e   : > { %v427_v21 = vsel %vm424_vm1, %v3421_v46, %v358_v0 }
  0xa2   : > { %v393_v7 = vpop.permute.xlu1 %392 }
  0xa3   : > { %v448_v16 = vsel %vm424_vm1, %v3447_v39, %v393_v7 }
  0xa4   : > { %v450_v17 = vsel %vm428_vm2, %v448_v16, %v398_v9  ;;  %v471_v20 = vpop.permute.xlu2 %470 }
  0xa5   : > { %v363_v6 = vpop.permute.xlu0 %362  ;;  %v489_v52 = vshrl.u32 %v471_v20, 16 }
  0xa6   : > { %v430_v22 = vsel %vm428_vm2, %v427_v21, %v363_v6 }
  0xaa   : > { %v408_v15 = vpop.permute.xlu1 %407 }
  0xac   : > { %v477_v44 = vpop.permute.xlu2 %476 }
  0xad   : > { %v388_v13 = vpop.permute.xlu0 %387  ;;  %v502_v55 = vshrl.u32 %v477_v44, 16 }
  0xb2   : > { %v368_v25 = vpop.permute.xlu1 %367 }
  0xb3   : > { %v433_v29 = vsel %vm431_vm3, %v430_v22, %v368_v25 }
  0xb4   : > { %v436_v33 = vsel %vm434_vm4, %v433_v29, %v373_v63  ;;  %v483_v50 = vpop.permute.xlu2 %482 }
  0xb5   : > { %v403_v19 = vpop.permute.xlu0 %402  ;;  %v439_v36 = vsel %vm437_vm5, %v436_v33, %v378_v61  ;;  %v496_v54 = vshrl.u32 %v483_v50, 16 }
  0xb6   : > { %v452_v27 = vsel %vm431_vm3, %v450_v17, %v403_v19  ;;  %v442_v46 = vsel %vm440_vm6, %v439_v36, %v383_v1 }
  0xb7   : > { %v454_v34 = vsel %vm434_vm4, %v452_v27, %v408_v15  ;;  %v445_v38 = vsel %vm443_vm7, %v442_v46, %v388_v13 }
  0xb8   : > { %v754_v39 = vsel %vm720_vm8, %v445_v38, 0  ;;  %v456_v28 = vsel %vm437_vm5, %v454_v34, %v413_v62 }
  0xb9   : > { %765 = vmatpush.bf16.msra.mxu2 %v754_v39 }
  0xba   : > { %v423_v43 = vpop.permute.xlu1 %422 }
  0xbd   : > { %v418_v41 = vpop.permute.xlu0 %417 }
  0xbe   : > { %v458_v42 = vsel %vm440_vm6, %v456_v28, %v418_v41  ;;  %v789_v28 = vpop.permute.xlu2 %788 }
  0xbf   : > { %v460_v37 = vsel %vm443_vm7, %v458_v42, %v423_v43 }
  0xc0   : > { %v756_v45 = vsel %vm720_vm8, %v460_v37, 0 }
  0xc1   : > { %778 = vmatpush.bf16.msra.mxu3 %v756_v45 }
  0xc2   : > { %v475_v48 = vpop.permute.xlu1 %474 }
  0xc3   : > { %v488_v49 = vpack.i.b16 %v475_v48, %v471_v20  ;;  %v490_v53 = vshrl.u32 %v475_v48, 16 }
  0xc5   : > { %v473_v47 = vpop.permute.xlu0 %472  ;;  %v3515_v51 = vperm.slane %v488_v49, %v3348_v2  ;;  %v491_v62 = vpack.i.b16 %v490_v53, %v489_v52 }
  0xc6   : > { %v501_v58 = vshrl.u32 %v473_v47, 16  ;;  %v500_v63 = vpack.i.b16 %v477_v44, %v473_v47 }
  0xc7   : > { %v522_v57 = vrot.slane %v3515_v51, 4  ;;  %v3530_v15 = vperm.slane %v491_v62, %v3348_v2 }
  0xc8   : > { %v503_v6 = vpack.i.b16 %v502_v55, %v501_v58  ;;  %v3533_v16 = vperm.slane %v500_v63, %v3348_v2  ;;  %v795_v58 = vpop.permute.xlu2 %794 }
  0xc9   : > { %v821_v63 = vshrl.u32 %v795_v58, 16 }
  0xca   : > { %v481_v61 = vpop.permute.xlu1 %480  ;;  %v3538_v22 = vperm.slane %v503_v6, %v3348_v2  ;;  %v574_v46 = vrot.slane %v3533_v16, 4 }
  0xcb   : > { %v507_v17 = vshrl.u32 %v481_v61, 16 }
  0xcc   : > { %v600_v41 = vrot.slane %v3538_v22, 4 }
  0xcd   : > { %v479_v56 = vpop.permute.xlu0 %478 }
  0xce   : > { %v494_v59 = vpack.i.b16 %v483_v50, %v479_v56  ;;  %v495_v60 = vshrl.u32 %v479_v56, 16 }
  0xd0   : > { %v497_v0 = vpack.i.b16 %v496_v54, %v495_v60  ;;  %v3519_v1 = vperm.slane %v494_v59, %v3348_v2  ;;  %v804_v60 = vshrl.u32 %v789_v28, 16 }
  0xd2   : > { %v3522_v7 = vperm.slane %v497_v0, %v3348_v2  ;;  %v523_v9 = vsel %vm260_vm0, %v3519_v1, %v522_v57  ;;  %v787_v33 = vpop.permute.xlu1 %786 }
  0xd3   : > { %v3527_v13 = vperm.slane %v523_v9, %v3376_v18 }
  0xd4   : > { %v546_v19 = vrot.slane %v3522_v7, 4 }
  0xd5   : > { %v485_v20 = vpop.permute.xlu0 %484  ;;  %v630_v21 = vunpack.c.l.b16 %v3527_v13 }
  0xd6   : > { %v506_v25 = vpack.i.b16 %v485_v20, %v481_v61  ;;  %v508_v27 = vshrl.u32 %v485_v20, 16  ;;  %v547_v29 = vsel %vm260_vm0, %v546_v19, %v3530_v15 }
  0xd7   : > { %v631_v34 = vpack.c.b16 %v630_v21, %v630_v21  ;;  %v3543_v36 = vperm.slane %v547_v29, %v3376_v18 }
  0xd8   : > { %v509_v38 = vpack.i.b16 %v508_v27, %v507_v17  ;;  %v3547_v39 = vperm.slane %v506_v25, %v3348_v2 }
  0xd9   : > { %632 = vrot.lane.b32.xlu1 %v631_v34, %s3257_s6  ;;  %v615_v44 = vunpack.c.l.b16 %v3543_v36  ;;  %v815_v34 = vshrl.u32 %v787_v33, 16 }
  0xda   : > { %v3552_v42 = vperm.slane %v509_v38, %v3348_v2  ;;  %v575_v43 = vsel %vm260_vm0, %v3547_v39, %v574_v46  ;;  %v793_v52 = vpop.permute.xlu1 %792 }
  0xdb   : > { %v583_v37 = vperm.slane %v575_v43, %v3376_v18  ;;  %v616_v53 = vpack.c.b16 %v615_v44, %v615_v44 }
  0xdc   : > { %v601_v45 = vsel %vm260_vm0, %v3552_v42, %v600_v41 }
  0xdd   : > { %v785_v47 = vpop.permute.xlu0 %784  ;;  %v665_v48 = vunpack.c.l.b16 %v583_v37  ;;  %v3561_v49 = vperm.slane %v601_v45, %v3376_v18  ;;  %v586_v50 = vrot.slane %v583_v37, 4 }
  0xde   : > { %v803_v61 = vshrl.u32 %v785_v47, 16  ;;  %v802_v9 = vpack.i.b16 %v789_v28, %v785_v47  ;;  %v809_v28 = vshrl.u32 %v793_v52, 16 }
  0xdf   : > { %v666_v54 = vpack.c.b16 %v665_v48, %v665_v48  ;;  %v670_v55 = vunpack.c.l.b16 %v3561_v49  ;;  %v587_v56 = vsel %vm260_vm0, 0, %v586_v50 }
  0xe0   : > { %v675_v59 = vunpack.c.l.b16 %v587_v56  ;;  %v805_v21 = vpack.i.b16 %v804_v60, %v803_v61  ;;  %v3573_v46 = vperm.slane %v802_v9, %v3348_v2  ;;  %v1070_v9 = vshll.u32 %v3351_v3, 16 }
  0xe1   : > { %617 = vrot.lane.b32.xlu1 %v616_v53, %s3258_s7  ;;  %667 = vrot.lane.b32.xlu2 %v666_v54, %s3257_s6  ;;  %v671_v57 = vpack.c.b16 %v670_v55, %v670_v55  ;;  %v1129_v3 = vrot.slane %v235_v14, 4 }
  0xe2   : > { %v799_v0 = vpop.permute.xlu1 %798  ;;  %v676_v6 = vpack.c.b16 %v675_v59, %v675_v59  ;;  %v3580_v43 = vperm.slane %v805_v21, %v3348_v2  ;;  %v836_v50 = vrot.slane %v3573_v46, 4 }
  0xe3   : > { %672 = vrot.lane.b32.xlu0 %v671_v57, %s3259_s8  ;;  %v822_v17 = vshrl.u32 %v799_v0, 16  ;;  %v820_v19 = vpack.i.b16 %v799_v0, %v795_v58 }
  0xe4   : > { %v862_v56 = vrot.slane %v3580_v43, 4 }
  0xe5   : > { %v791_v62 = vpop.permute.xlu0 %790  ;;  %v823_v25 = vpack.i.b16 %v822_v17, %v821_v63  ;;  %v3570_v27 = vperm.slane %v820_v19, %v3348_v2  ;;  %v598_v17 = vrot.slane %v3552_v42, 4 }
  0xe6   : > { %v814_v20 = vpack.i.b16 %v791_v62, %v787_v33  ;;  %v816_v29 = vshrl.u32 %v791_v62, 16  ;;  %v548_v33 = vrot.slane %v3530_v15, 4 }
  0xe7   : > { %v886_v38 = vrot.slane %v3570_v27, 4  ;;  %v3583_v37 = vperm.slane %v823_v25, %v3348_v2 }
  0xe8   : > { %v3577_v41 = vperm.slane %v814_v20, %v3348_v2  ;;  %v817_v45 = vpack.i.b16 %v816_v29, %v815_v34  ;;  %v549_v60 = vsel %vm260_vm0, %v3522_v7, %v548_v33  ;;  %v1110_v34 = vshll.u32 %v3357_v5, 16 }
  0xe9   : > { %677 = vrot.lane.b32.xlu1 %v676_v6, %s3262_s11  ;;  %v912_v57 = vrot.slane %v3583_v37, 4  ;;  %v557_v19 = vperm.slane %v549_v60, %v3376_v18  ;;  %v534_v60 = vrot.slane %v3527_v13, 4 }
  0xea   : > { %v887_v55 = vsel %vm260_vm0, %v886_v38, %v3577_v41  ;;  %v3595_v58 = vperm.slane %v817_v45, %v3348_v2  ;;  %v1130_v38 = vshll.u32 %v3360_v8, 16  ;;  %v1069_v45 = vrot.slane %v228_v10, 4 }
  0xeb   : > { %v3606_v61 = vperm.slane %v887_v55, %v3376_v18  ;;  %v535_v13 = vsel %vm260_vm0, 0, %v534_v60 }
  0xec   : > { %v913_v7 = vsel %vm260_vm0, %v912_v57, %v3595_v58  ;;  %v1109_v57 = vrot.slane %v234_v12, 4  ;;  %v1132_v10 = vrot.slane %v1130_v38, 5 }
  0xed   : > { %v797_v44 = vpop.permute.xlu0 %796  ;;  %v898_v29 = vrot.slane %v3606_v61, 4 }
  0xee   : > { %v808_v47 = vpack.i.b16 %v797_v44, %v793_v52  ;;  %v810_v48 = vshrl.u32 %v797_v44, 16  ;;  %v3625_v44 = vperm.slane %v913_v7, %v3376_v18  ;;  %v1133_v7 = vor.u32 %v1132_v10, %v1129_v3 }
  0xef   : > { %v899_v55 = vsel %vm260_vm0, 0, %v898_v29 }
  0xf0   : > { %v811_v53 = vpack.i.b16 %v810_v48, %v809_v28  ;;  %v3588_v54 = vperm.slane %v808_v47, %v3348_v2  ;;  %v1090_v47 = vshll.u32 %v3354_v4, 16  ;;  %v572_v48 = vrot.slane %v3547_v39, 4 }
  0xf1   : > { %v1089_v39 = vrot.slane %v229_v11, 4  ;;  %v520_v4 = vrot.slane %v3519_v1, 4  ;;  %v1134_v38 = vrot.slane %v1133_v7, 4 }
  0xf2   : > { %v3598_v52 = vperm.slane %v811_v53, %v3348_v2  ;;  %v837_v15 = vsel %vm260_vm0, %v3588_v54, %v836_v50  ;;  %v1072_v50 = vrot.slane %v1070_v9, 5  ;;  %v635_v53 = vunpack.c.l.b16 %v557_v19 }
  0xf3   : > { %v845_v59 = vperm.slane %v837_v15, %v3376_v18  ;;  %v1112_v15 = vrot.slane %v1110_v34, 5  ;;  %v573_v5 = vsel %vm260_vm0, %v572_v48, %v3533_v16  ;;  %v1135_v48 = vshll.u32 %v3398_v30, 16 }
  0xf4   : > { %v863_v62 = vsel %vm260_vm0, %v3598_v52, %v862_v56  ;;  %v599_v56 = vsel %vm260_vm0, %v598_v17, %v3538_v22  ;;  %v1073_v12 = vor.u32 %v1072_v50, %v1069_v45  ;;  %v860_v14 = vrot.slane %v3598_v52, 4 }
  0xf5   : > { %v944_v63 = vunpack.c.l.b16 %v845_v59  ;;  %v3611_v0 = vperm.slane %v863_v62, %v3376_v18  ;;  %v848_v6 = vrot.slane %v845_v59, 4  ;;  %v964_v59 = vunpack.c.l.b16 %v3625_v44 }
  0xf6   : > { %v969_v62 = vunpack.c.l.b16 %v899_v55  ;;  %v605_v22 = vperm.slane %v599_v56, %v3376_v18  ;;  %v636_v9 = vpack.c.b16 %v635_v53, %v635_v53  ;;  %v1113_v17 = vor.u32 %v1112_v15, %v1109_v57 }
  0xf7   : > { %v945_v20 = vpack.c.b16 %v944_v63, %v944_v63  ;;  %v949_v21 = vunpack.c.l.b16 %v3611_v0  ;;  %v849_v25 = vsel %vm260_vm0, 0, %v848_v6  ;;  %v560_v63 = vrot.slane %v557_v19, 4 }
  0xf8   : > { %v954_v28 = vunpack.c.l.b16 %v849_v25  ;;  %v1092_v6 = vrot.slane %v1090_v47, 5  ;;  %v965_v11 = vpack.c.b16 %v964_v59, %v964_v59  ;;  %v834_v19 = vrot.slane %v3588_v54, 4 }
  0xf9   : > { %946 = vrot.lane.b32.xlu2 %v945_v20, %s3257_s6  ;;  %v950_v42 = vpack.c.b16 %v949_v21, %v949_v21  ;;  %v3652_v20 = vperm.slane %v573_v5, %v3376_v18  ;;  %v970_v16 = vpack.c.b16 %v969_v62, %v969_v62  ;;  %v650_v21 = vunpack.c.l.b16 %v605_v22 }
  0xfa   : > { %v955_v33 = vpack.c.b16 %v954_v28, %v954_v28  ;;  %v561_v25 = vsel %vm260_vm0, 0, %v560_v63  ;;  %v1074_v52 = vrot.slane %v1073_v12, 4  ;;  %v1093_v29 = vor.u32 %v1092_v6, %v1089_v39 }
  0xfb   : > { %951 = vrot.lane.b32.xlu0 %v950_v42, %s3259_s8  ;;  %v861_v1 = vsel %vm260_vm0, %v860_v14, %v3580_v43  ;;  %v1114_v34 = vrot.slane %v1113_v17, 4  ;;  %v640_v28 = vunpack.c.l.b16 %v535_v13  ;;  %v521_v42 = vsel %vm260_vm0, %v520_v4, %v3515_v51 }
  0xfc   : > { %956 = vrot.lane.b32.xlu1 %v955_v33, %s3262_s11  ;;  %v645_v54 = vunpack.c.l.b16 %v561_v25  ;;  %v584_v45 = vrot.slane %v3652_v20, 4  ;;  %v1115_v47 = vshll.u32 %v3392_v26, 16  ;;  %v651_v33 = vpack.c.b16 %v650_v21, %v650_v21 }
  0xfd   : > { %v867_v50 = vperm.slane %v861_v1, %v3376_v18  ;;  %v610_v53 = vrot.slane %v605_v22, 4  ;;  %v835_v43 = vsel %vm260_vm0, %v834_v19, %v3573_v46  ;;  %v1075_v55 = vshll.u32 %v3385_v23, 16 }
  0xfe   : > { %v1095_v51 = vshll.u32 %v3388_v24, 16  ;;  %v1094_v56 = vrot.slane %v1093_v29, 4  ;;  %v3671_v57 = vperm.slane %v521_v42, %v3376_v18  ;;  %v3677_v3 = vrot.slane %v1115_v47, 5 }
  0xff   : > { %v3679_v10 = vrot.slane %v1135_v48, 5  ;;  %v641_v46 = vpack.c.b16 %v640_v28, %v640_v28  ;;  %v646_v39 = vpack.c.b16 %v645_v54, %v645_v54  ;;  %v585_v59 = vsel %vm260_vm0, 0, %v584_v45 }
 0x100   : > { %v3684_v60 = vperm.slane %v835_v43, %v3376_v18  ;;  %v3686_v62 = vrot.slane %v1075_v55, 5  ;;  %v3688_v22 = vrot.slane %v1095_v51, 5  ;;  %v3693_v63 = vsel %vm3673_vm11, %v1114_v34, %v3677_v3 }
 0x101   : > { %637 = vrot.lane.b32.xlu2 %v636_v9, %s3259_s8  ;;  %v3698_v5 = vsel %vm3673_vm11, %v1134_v38, %v3679_v10  ;;  %v929_v12 = vunpack.c.l.b16 %v867_v50  ;;  %v611_v6 = vsel %vm260_vm0, 0, %v610_v53  ;;  %v532_v14 = vrot.slane %v3671_v57, 4 }
 0x102   : > { %v655_v9 = vunpack.c.l.b16 %v585_v59  ;;  %v1157_v17 = vshrl.u32 %v3693_v63, 16  ;;  %v1158_v7 = vshrl.u32 %v3698_v5, 16  ;;  %v660_v4 = vunpack.c.l.b16 %v611_v6 }
 0x103   : > { %966 = vrot.lane.b32.xlu0 %v965_v11, %s3258_s7  ;;  %v846_v11 = vrot.slane %v3684_v60, 4  ;;  %v3710_v13 = vsel %vm3673_vm11, %v1074_v52, %v3686_v62  ;;  %v3715_v19 = vsel %vm3673_vm11, %v1094_v56, %v3688_v22  ;;  %v872_v21 = vrot.slane %v867_v50, 4 }
 0x104   : > { %971 = vrot.lane.b32.xlu1 %v970_v16, %s3260_s9  ;;  %v930_v16 = vpack.c.b16 %v929_v12, %v929_v12  ;;  %v533_v25 = vsel %vm260_vm0, 0, %v532_v14  ;;  %v656_v29 = vpack.c.b16 %v655_v9, %v655_v9  ;;  %v1151_v1 = vshrl.u32 %v3710_v13, 16 }
 0x105   : > { %v1152_v34 = vshrl.u32 %v3715_v19, 16  ;;  %v1159_v38 = vpack.i.b16 %v1158_v7, %v1157_v17  ;;  %v661_v28 = vpack.c.b16 %v660_v4, %v660_v4  ;;  %v847_v52 = vsel %vm260_vm0, 0, %v846_v11 }
 0x106   : > { %v914_v42 = vrot.slane %v3595_v58, 4  ;;  %v620_v54 = vunpack.c.l.b16 %v533_v25  ;;  %v873_v45 = vsel %vm260_vm0, 0, %v872_v21  ;;  %v612_v47 = vrot.slane %v3561_v49, 4 }
 0x107   : > { %v934_v48 = vunpack.c.l.b16 %v847_v52  ;;  %v3728_v50 = vperm.slane %v1159_v38, %v3348_v2  ;;  %v939_v53 = vunpack.c.l.b16 %v873_v45  ;;  %v558_v43 = vrot.slane %v3543_v36, 4 }
 0x108   : > { %v621_v55 = vpack.c.b16 %v620_v54, %v620_v54  ;;  %v915_v58 = vsel %vm260_vm0, %v3583_v37, %v914_v42  ;;  %v613_v51 = vsel %vm260_vm0, 0, %v612_v47  ;;  %v874_v6 = vrot.slane %v3611_v0, 4 }
 0x109   : > { %652 = vrot.lane.b32.xlu2 %v651_v33, %s3258_s7  ;;  %v1153_v33 = vpack.i.b16 %v1152_v34, %v1151_v1  ;;  %v935_v56 = vpack.c.b16 %v934_v48, %v934_v48  ;;  %v1208_v49 = vrot.slane %v3728_v50, 4  ;;  %v940_v59 = vpack.c.b16 %v939_v53, %v939_v53 }
 0x10a   : > { %v559_v12 = vsel %vm260_vm0, 0, %v558_v43  ;;  %v923_v36 = vperm.slane %v915_v58, %v3376_v18  ;;  %v680_v37 = vunpack.c.l.b16 %v613_v51  ;;  %v875_v4 = vsel %vm260_vm0, 0, %v874_v6 }
 0x10b   : > { %642 = vrot.lane.b32.xlu0 %v641_v46, %s3262_s11  ;;  %v3736_v46 = vperm.slane %v1153_v33, %v3348_v2  ;;  %v625_v14 = vunpack.c.l.b16 %v559_v12  ;;  %v959_v0 = vunpack.c.l.b16 %v875_v4  ;;  %v924_v1 = vrot.slane %v3625_v44, 4 }
 0x10c   : > { %647 = vrot.lane.b32.xlu1 %v646_v39, %s3261_s10  ;;  %v888_v39 = vrot.slane %v3577_v41, 4  ;;  %v984_v17 = vunpack.c.l.b16 %v923_v36  ;;  %v681_v7 = vpack.c.b16 %v680_v37, %v680_v37  ;;  %v926_v34 = vrot.slane %v923_v36, 4 }
 0x10d   : > { %v1209_v9 = vsel %vm260_vm0, %v1208_v49, %v3736_v46  ;;  %v960_v38 = vpack.c.b16 %v959_v0, %v959_v0  ;;  %v925_v52 = vsel %vm260_vm0, 0, %v924_v1  ;;  %v1156_v42 = vpack.i.b16 %v3698_v5, %v3693_v63  ;;  %v3805_v1 = vld [vmem:[%s3346_s5 + $0x8] sm:$0x1] }
 0x10e   : > { %v889_v41 = vsel %vm260_vm0, %v3570_v27, %v888_v39  ;;  %v1215_v11 = vperm.slane %v1209_v9, %v3376_v18  ;;  %v985_v25 = vpack.c.b16 %v984_v17, %v984_v17  ;;  %v927_v45 = vsel %vm260_vm0, 0, %v926_v34 }
 0x10f   : > { %v897_v21 = vperm.slane %v889_v41, %v3376_v18  ;;  %v1150_v47 = vpack.i.b16 %v3715_v19, %v3710_v13  ;;  %v3764_v44 = vperm.slane %v1156_v42, %v3348_v2  ;;  %v974_v48 = vunpack.c.l.b16 %v925_v52 }
 0x110   : > { %v1220_v53 = vrot.slane %v1215_v11, 4  ;;  %v994_v58 = vunpack.c.l.b16 %v927_v45  ;;  %v1140_v51 = vrot.slane %v247_v40, 4  ;;  %v1120_v0 = vrot.slane %v246_v35, 4 }
 0x111   : > { %931 = vrot.lane.b32.xlu2 %v930_v16, %s3258_s7  ;;  %v626_v16 = vpack.c.b16 %v625_v14, %v625_v14  ;;  %v979_v27 = vunpack.c.l.b16 %v897_v21  ;;  %v900_v33 = vrot.slane %v897_v21, 4  ;;  %v3769_v43 = vperm.slane %v1150_v47, %v3348_v2  ;;  %v218_v47 = vld [vmem:[%s3346_s5 + $0x14] sm:$0x1] }
 0x112   : > { %v975_v39 = vpack.c.b16 %v974_v48, %v974_v48  ;;  %v1221_v36 = vsel %vm260_vm0, 0, %v1220_v53  ;;  %v995_v37 = vpack.c.b16 %v994_v58, %v994_v58  ;;  %v1141_v6 = vor.u32 %v1140_v51, %v3679_v10 }
 0x113   : > { %657 = vrot.lane.b32.xlu0 %v656_v29, %s3260_s9  ;;  %v1277_v29 = vunpack.c.l.b16 %v1215_v11  ;;  %v980_v54 = vpack.c.b16 %v979_v27, %v979_v27  ;;  %v901_v12 = vsel %vm260_vm0, 0, %v900_v33  ;;  %v1287_v17 = vunpack.c.l.b16 %v1221_v36  ;;  %v221_v27 = vld [vmem:[%s3346_s5 + $0x20] sm:$0x1] }
 0x114   : > { %662 = vrot.lane.b32.xlu1 %v661_v28, %s3263_s12  ;;  %v989_v9 = vunpack.c.l.b16 %v901_v12  ;;  %v1142_v41 = vrot.slane %v1141_v6, 4  ;;  %v1124_v52 = vshll.u32 %v221_v27, 16  ;;  %v1100_v48 = vrot.slane %v241_v32, 4 }
 0x115   : > { %v1278_v28 = vpack.c.b16 %v1277_v29, %v1277_v29  ;;  %v1104_v33 = vshll.u32 %v218_v47, 16  ;;  %v2005_v58 = vrot.slane %v3398_v30, 5 }
 0x116   : > { %v990_v11 = vpack.c.b16 %v989_v9, %v989_v9  ;;  %v1101_v53 = vor.u32 %v1100_v48, %v3688_v22  ;;  %v1998_v22 = vrot.slane %v3392_v26, 5 }
 0x117   : > { %v1106_v32 = vrot.slane %v1104_v33, 5 }
 0x118   : > { %v2000_v26 = vrot.slane %v1998_v22, 4 }
 0x119   : > { %622 = vrot.lane.b32.xlu2 %v621_v55, %s3260_s9  ;;  %v1182_v55 = vrot.slane %v3764_v44, 4 }
 0x11b   : > { %936 = vrot.lane.b32.xlu0 %v935_v56, %s3260_s9  ;;  %v3775_v56 = vld [vmem:[%s3346_s5 + $0x2c] sm:$0x1]  ;;  %v1183_v49 = vsel %vm260_vm0, %v1182_v55, %v3769_v43  ;;  %v3050_v55 = vrot.slane %v3360_v8, 9  ;;  %v1102_v8 = vrot.slane %v1101_v53, 4 }
 0x11c   : > { %941 = vrot.lane.b32.xlu1 %v940_v59, %s3263_s12  ;;  %v3780_v59 = vperm.slane %v1183_v49, %v3376_v18  ;;  %v1144_v40 = vshll.u32 %v3775_v56, 16  ;;  %v3130_v53 = vld [vmem:[%s3346_s5 + $0xc] sm:$0xf] }
 0x11d   : > { %v3854_v30 = vsel %vm3840_vm14, %v3050_v55, %v2005_v58  ;;  %v3048_v55 = vrot.slane %v3130_v53, 9 }
 0x11e   : > { %v1194_v14 = vrot.slane %v3780_v59, 4  ;;  %v2020_v36 = vshrl.u32 %v3854_v30, 16 }
 0x120   : > { %v1195_v4 = vsel %vm260_vm0, 0, %v1194_v14  ;;  %v2001_v14 = vrot.slane %v221_v27, 5 }
 0x121   : > { %682 = vrot.lane.b32.xlu2 %v681_v7, %s3261_s10  ;;  %v1146_v7 = vrot.slane %v1144_v40, 5  ;;  %v1282_v21 = vunpack.c.l.b16 %v1195_v4  ;;  %v3869_v40 = vsel %vm3673_vm11, %v1102_v8, %v1106_v32  ;;  %v1994_v4 = vrot.slane %v218_v47, 5 }
 0x123   : > { %627 = vrot.lane.b32.xlu0 %v626_v16, %s3263_s12  ;;  %v1288_v16 = vpack.c.b16 %v1287_v17, %v1287_v17  ;;  %v3795_v10 = vsel %vm3673_vm11, %v1142_v41, %v1146_v7  ;;  %v1283_v29 = vpack.c.b16 %v1282_v21, %v1282_v21  ;;  %v3128_v7 = vld [vmem:[%s3346_s5 + $0x10] sm:$0xf]  ;;  %v2007_v21 = vrot.slane %v2005_v58, 4 }
 0x124   : > { %986 = vrot.lane.b32.xlu1 %v985_v25, %s3259_s8  ;;  %v1080_v25 = vrot.slane %v240_v31, 4  ;;  %v1991_v15 = vrot.slane %v3128_v7, 5  ;;  %v1170_v7 = vshrl.u32 %v3795_v10, 16 }
 0x126   : > { %v1081_v34 = vor.u32 %v1080_v25, %v3686_v62  ;;  %v2008_v25 = vrot.slane %v3775_v56, 5  ;;  %v3929_v32 = vsel %vm3840_vm14, %v3048_v55, %v1991_v15 }
 0x128   : > { %v1082_v31 = vrot.slane %v1081_v34, 4  ;;  %v3898_v34 = vsel %vm3840_vm14, %v2007_v21, %v2008_v25 }
 0x129   : > { %961 = vrot.lane.b32.xlu2 %v960_v38, %s3261_s10  ;;  %v1084_v38 = vshll.u32 %v3805_v1, 16 }
 0x12b   : > { %981 = vrot.lane.b32.xlu0 %v980_v54, %s3257_s6  ;;  %v1086_v35 = vrot.slane %v1084_v38, 5  ;;  %v1126_v54 = vrot.slane %v1124_v52, 5  ;;  %v3129_v38 = vld [vmem:[%s3346_s5] sm:$0xf] }
 0x12c   : > { %1279 = vrot.lane.b32.xlu1 %v1278_v28, %s3258_s7  ;;  %v1121_v28 = vor.u32 %v1120_v0, %v3677_v3 }
 0x12d   : > { %v3818_v62 = vsel %vm3673_vm11, %v1082_v31, %v1086_v35  ;;  %v2032_v31 = vshrl.u32 %v3898_v34, 16 }
 0x12e   : > { %v1122_v42 = vrot.slane %v1121_v28, 4  ;;  %v3047_v28 = vrot.slane %v3129_v38, 9 }
 0x130   : > { %v3822_v3 = vsel %vm3673_vm11, %v1122_v42, %v1126_v54 }
 0x131   : > { %976 = vrot.lane.b32.xlu2 %v975_v39, %s3263_s12  ;;  %v3127_v39 = vld [vmem:[%s3346_s5 + $0x18] sm:$0xf]  ;;  %s3151_s5 = scalar_lea.hbm %s4850_s3, 2 }
 0x132   : > { %v3049_v12 = vrot.slane %v3127_v39, 9 }
 0x133   : > { %996 = vrot.lane.b32.xlu0 %v995_v37, %s3261_s10  ;;  %v1984_v37 = vrot.slane %v3385_v23, 5  ;;  %v1987_v23 = vrot.slane %v3805_v1, 5  ;;  %v1993_v1 = vrot.slane %v1991_v15, 4  ;;  %v1169_v15 = vshrl.u32 %v3822_v3, 16 }
 0x134   : > { %1421 = vrot.lane.b32.xlu1 %v3693_v63, %s3264_s13 }
 0x135   : > { %v1986_v9 = vrot.slane %v1984_v37, 4  ;;  %v3903_v52 = vsel %vm3840_vm14, %v1993_v1, %v1994_v4  ;;  %v3921_v33 = vsel %vm3840_vm14, %v3047_v28, %v1984_v37  ;;  %v1171_v1 = vpack.i.b16 %v1170_v7, %v1169_v15 }
 0x136   : > { %v2026_v42 = vshrl.u32 %v3903_v52, 16  ;;  %v2013_v58 = vshrl.u32 %v3921_v33, 16 }
 0x137   : > { %v1259_v38 = vperm.slane %v1171_v1, %v3348_v2 }
 0x139   : > { %991 = vrot.lane.b32.xlu2 %v990_v11, %s3262_s11  ;;  %v1260_v53 = vrot.slane %v1259_v38, 4 }
 0x13b   : > { %1289 = vrot.lane.b32.xlu0 %v1288_v16, %s3263_s12  ;;  %v3826_v45 = vpop.permute.xlu2 %667  ;;  %v3887_v16 = vsel %vm3840_vm14, %v2000_v26, %v2001_v14 }
 0x13c   : > { %1427 = vrot.lane.b32.xlu1 %v3795_v10, %s3264_s13  ;;  %v2031_v0 = vshrl.u32 %v3887_v16, 16  ;;  %v2030_v56 = vpack.i.b16 %v3898_v34, %v3887_v16 }
 0x13e   : > { %v3913_v54 = vpack.i.b16 %v2032_v31, %v2031_v0  ;;  %v1163_v0 = vshrl.u32 %v3818_v62, 16 }
 0x141   : > { %1284 = vrot.lane.b32.xlu2 %v1283_v29, %s3260_s9  ;;  %v3893_v29 = vsel %vm3840_vm14, %v1986_v9, %v1987_v23 }
 0x142   : > { %v2025_v27 = vshrl.u32 %v3893_v29, 16  ;;  %v2024_v35 = vpack.i.b16 %v3903_v52, %v3893_v29 }
 0x143   : > { %1425 = vrot.lane.b32.xlu0 %v3698_v5, %s3264_s13 }
 0x144   : > { %1417 = vrot.lane.b32.xlu1 %v3715_v19, %s3264_s13  ;;  %v3915_v47 = vpack.i.b16 %v2026_v42, %v2025_v27  ;;  %v1164_v27 = vshrl.u32 %v3869_v40, 16 }
 0x146   : > { %v1165_v28 = vpack.i.b16 %v1164_v27, %v1163_v0 }
 0x148   : > { %v1254_v42 = vperm.slane %v1165_v28, %v3348_v2 }
 0x149   : > { %1423 = vrot.lane.b32.xlu2 %v3822_v3, %s3264_s13 }
 0x14b   : > { %1415 = vrot.lane.b32.xlu0 %v3818_v62, %s3264_s13  ;;  %v3844_v49 = vpop.permute.xlu1 %632 }
 0x14c   : > { %1704 = vrot.lane.b32.xlu1 %v3822_v3, %s3265_s14 }
 0x151   : > { %1413 = vrot.lane.b32.xlu2 %v3710_v13, %s3264_s13 }
 0x153   : > { %v3846_v24 = vpop.permute.xlu2 %946  ;;  %1702 = vrot.lane.b32.xlu0 %v3693_v63, %s3265_s14  ;;  %v3862_v63 = vsel %vm3840_vm14, %v3049_v12, %v1998_v22  ;;  %v3881_v11 = vpop.permute.xlu1 %617  ;;  %v2014_v22 = vshrl.u32 %v3929_v32, 16  ;;  %v1168_v12 = vpack.i.b16 %v3795_v10, %v3822_v3 }
 0x154   : > { %1694 = vrot.lane.b32.xlu1 %v3710_v13, %s3265_s14  ;;  %v2018_v13 = vpack.i.b16 %v3854_v30, %v3862_v63  ;;  %v2019_v6 = vshrl.u32 %v3862_v63, 16 }
 0x155   : > { %v3936_v39 = vpack.i.b16 %v2014_v22, %v2013_v58  ;;  %v1233_v37 = vperm.slane %v1168_v12, %v3348_v2  ;;  %v1184_v22 = vrot.slane %v3769_v43, 4 }
 0x156   : > { %v3874_v17 = vpack.i.b16 %v2020_v36, %v2019_v6  ;;  %v1162_v6 = vpack.i.b16 %v3869_v40, %v3818_v62 }
 0x157   : > { %v1234_v14 = vrot.slane %v1233_v37, 4  ;;  %v1185_v0 = vsel %vm260_vm0, %v3764_v44, %v1184_v22  ;;  %v1262_v22 = vrot.slane %v1254_v42, 4 }
 0x158   : > { %v1228_v9 = vperm.slane %v1162_v6, %v3348_v2 }
 0x159   : > { %1419 = vrot.lane.b32.xlu2 %v3869_v40, %s3264_s13 }
 0x15a   : > { %v1235_v25 = vsel %vm260_vm0, %v1234_v14, %v1228_v9  ;;  %v1236_v55 = vrot.slane %v1228_v9, 4  ;;  %v1261_v14 = vsel %vm260_vm0, %v1260_v53, %v1254_v42  ;;  %v1210_v42 = vrot.slane %v3736_v46, 4 }
 0x15b   : > { %v3876_v41 = vpop.permute.xlu2 %637  ;;  %1708 = vrot.lane.b32.xlu0 %v3795_v10, %s3265_s14  ;;  %v3931_v8 = vpop.permute.xlu1 %677  ;;  %v3976_v10 = vperm.slane %v1235_v25, %v3376_v18  ;;  %v1267_v27 = vperm.slane %v1261_v14, %v3376_v18 }
 0x15c   : > { %1700 = vrot.lane.b32.xlu1 %v3869_v40, %s3265_s14  ;;  %v1237_v15 = vsel %vm260_vm0, %v1233_v37, %v1236_v55 }
 0x15d   : > { %v1246_v40 = vrot.slane %v3976_v10, 4  ;;  %v4011_v53 = vperm.slane %v1237_v15, %v3376_v18  ;;  %v1312_v55 = vunpack.c.l.b16 %v1267_v27 }
 0x15f   : > { %v1247_v58 = vsel %vm260_vm0, 0, %v1246_v40  ;;  %v1313_v15 = vpack.c.b16 %v1312_v55, %v1312_v55 }
 0x160   : > { %v1317_v6 = vunpack.c.l.b16 %v1247_v58  ;;  %v1327_v58 = vunpack.c.l.b16 %v4011_v53 }
 0x161   : > { %1706 = vrot.lane.b32.xlu2 %v3698_v5, %s3265_s14  ;;  %v673_v5 = vpop.permute.xlu0 %672 }
 0x162   : > { %v1318_v40 = vpack.c.b16 %v1317_v6, %v1317_v6 }
 0x163   : > { %v653_v48 = vpop.permute.xlu2 %652  ;;  %1698 = vrot.lane.b32.xlu0 %v3715_v19, %s3265_s14  ;;  %v2012_v19 = vpack.i.b16 %v3929_v32, %v3921_v33 }
 0x164   : > { %2287 = vrot.lane.b32.xlu1 %v3854_v30, %s3264_s13  ;;  %v701_v9 = vsel %vm424_vm1, %v3652_v20, %v653_v48  ;;  %v1193_v48 = vperm.slane %v1185_v0, %v3376_v18  ;;  %v1263_v0 = vsel %vm260_vm0, %v1259_v38, %v1262_v22  ;;  %v686_v38 = vsel %vm424_vm1, %v3671_v57, %v3881_v11 }
 0x166   : > { %v1196_v14 = vrot.slane %v1193_v48, 4 }
 0x169   : > { %1696 = vrot.lane.b32.xlu2 %v3818_v62, %s3265_s14 }
 0x16b   : > { %v3942_v36 = vpop.permute.xlu2 %931  ;;  %2285 = vrot.lane.b32.xlu0 %v3887_v16, %s3264_s13 }
 0x16c   : > { %2277 = vrot.lane.b32.xlu1 %v3893_v29, %s3264_s13  ;;  %v1000_v6 = vsel %vm424_vm1, %v3684_v60, %v3942_v36  ;;  %v1197_v60 = vsel %vm260_vm0, 0, %v1196_v14  ;;  %v1272_v36 = vrot.slane %v1267_v27, 4 }
 0x16d   : > { %v3948_v51 = vpop.permute.xlu0 %951  ;;  %v1302_v46 = vunpack.c.l.b16 %v1197_v60 }
 0x16e   : > { %v3953_v26 = vpop.permute.xlu1 %956 }
 0x171   : > { %2283 = vrot.lane.b32.xlu2 %v3862_v63, %s3264_s13 }
 0x173   : > { %v3958_v23 = vpop.permute.xlu2 %622  ;;  %2275 = vrot.lane.b32.xlu0 %v3921_v33, %s3264_s13 }
 0x174   : > { %2564 = vrot.lane.b32.xlu1 %v3862_v63, %s3265_s14 }
 0x175   : > { %v3966_v4 = vpop.permute.xlu0 %966 }
 0x176   : > { %v3968_v21 = vpop.permute.xlu1 %971 }
 0x179   : > { %2289 = vrot.lane.b32.xlu2 %v3898_v34, %s3264_s13 }
 0x17b   : > { %v683_v3 = vpop.permute.xlu2 %682  ;;  %2281 = vrot.lane.b32.xlu0 %v3903_v52, %s3264_s13 }
 0x17c   : > { %2570 = vrot.lane.b32.xlu1 %v3898_v34, %s3265_s14 }
 0x17d   : > { %v3983_v62 = vpop.permute.xlu0 %642 }
 0x17e   : > { %v3986_v31 = vpop.permute.xlu1 %647 }
 0x181   : > { %2279 = vrot.lane.b32.xlu2 %v3929_v32, %s3264_s13  ;;  %s4784_s13 = scalar_lea.sflag [#allocation5], %s2866_s30 }
 0x183   : > { %v3993_v12 = vpop.permute.xlu2 %961  ;;  %2568 = vrot.lane.b32.xlu0 %v3854_v30, %s3265_s14 }
 0x184   : > { %2560 = vrot.lane.b32.xlu1 %v3929_v32, %s3265_s14 }
 0x185   : > { %v658_v7 = vpop.permute.xlu0 %657 }
 0x186   : > { %v703_v25 = vsel %vm428_vm2, %v701_v9, %v658_v7  ;;  %v663_v43 = vpop.permute.xlu1 %662 }
 0x187   : > { %v705_v1 = vsel %vm431_vm3, %v703_v25, %v663_v43  ;;  %v1328_v43 = vpack.c.b16 %v1327_v58, %v1327_v58  ;;  %v1303_v58 = vpack.c.b16 %v1302_v46, %v1302_v46 }
 0x188   : > { %v707_v28 = vsel %vm434_vm4, %v705_v1, %v3826_v45 }
 0x189   : > { %v709_v20 = vsel %vm437_vm5, %v707_v28, %v673_v5  ;;  %2566 = vrot.lane.b32.xlu2 %v3887_v16, %s3265_s14  ;;  %v1292_v28 = vunpack.c.l.b16 %v1193_v48 }
 0x18a   : > { %v711_v44 = vsel %vm440_vm6, %v709_v20, %v3931_v8  ;;  %v688_v20 = vsel %vm428_vm2, %v686_v38, %v3958_v23 }
 0x18b   : > { %v4019_v37 = vpop.permute.xlu2 %976  ;;  %2558 = vrot.lane.b32.xlu0 %v3893_v29, %s3265_s14  ;;  %v713_v45 = vsel %vm443_vm7, %v711_v44, %v683_v3  ;;  %v1211_v44 = vsel %vm260_vm0, %v3728_v50, %v1210_v42  ;;  %v1293_v11 = vpack.c.b16 %v1292_v28, %v1292_v28 }
 0x18c   : > { %1319 = vrot.lane.b32.xlu1 %v1318_v40, %s3260_s9  ;;  %v723_v5 = vsel %vm720_vm8, %v713_v45, 0  ;;  %v1219_v22 = vperm.slane %v1211_v44, %v3376_v18 }
 0x18d   : > { %745 = vmatpush.bf16.msra.mxu1 %v723_v5  ;;  %v937_v8 = vpop.permute.xlu0 %936  ;;  %v1273_v5 = vsel %vm260_vm0, 0, %v1272_v36 }
 0x18e   : > { %v1002_v9 = vsel %vm428_vm2, %v1000_v6, %v937_v8  ;;  %v942_v7 = vpop.permute.xlu1 %941 }
 0x18f   : > { %v1004_v3 = vsel %vm431_vm3, %v1002_v9, %v942_v7  ;;  %v1222_v7 = vrot.slane %v1219_v22, 4 }
 0x190   : > { %v1006_v25 = vsel %vm434_vm4, %v1004_v3, %v3846_v24  ;;  %v1271_v24 = vperm.slane %v1263_v0, %v3376_v18 }
 0x191   : > { %2556 = vrot.lane.b32.xlu2 %v3921_v33, %s3265_s14  ;;  %v1008_v40 = vsel %vm437_vm5, %v1006_v25, %v3948_v51  ;;  %v1223_v36 = vsel %vm260_vm0, 0, %v1222_v7 }
 0x192   : > { %v1274_v48 = vrot.slane %v1271_v24, 4  ;;  %v1010_v55 = vsel %vm440_vm6, %v1008_v40, %v3953_v26  ;;  %v1322_v26 = vunpack.c.l.b16 %v1273_v5  ;;  %v1332_v14 = vunpack.c.l.b16 %v1271_v24 }
 0x193   : > { %v992_v1 = vpop.permute.xlu2 %991  ;;  %1314 = vrot.lane.b32.xlu0 %v1313_v15, %s3258_s7  ;;  %v1012_v6 = vsel %vm443_vm7, %v1010_v55, %v3993_v12  ;;  %v1248_v24 = vrot.slane %v4011_v53, 4 }
 0x194   : > { %1329 = vrot.lane.b32.xlu1 %v1328_v43, %s3257_s6  ;;  %v1275_v8 = vsel %vm260_vm0, 0, %v1274_v48  ;;  %v1033_v12 = vsel %vm720_vm8, %v1012_v6, 0  ;;  %v1333_v42 = vpack.c.b16 %v1332_v14, %v1332_v14 }
 0x195   : > { %v628_v27 = vpop.permute.xlu0 %627  ;;  %v1342_v3 = vunpack.c.l.b16 %v1275_v8  ;;  %v1249_v48 = vsel %vm260_vm0, 0, %v1248_v24 }
 0x196   : > { %v690_v45 = vsel %vm431_vm3, %v688_v20, %v628_v27  ;;  %v987_v51 = vpop.permute.xlu1 %986  ;;  %v1337_v53 = vunpack.c.l.b16 %v1249_v48 }
 0x197   : > { %v692_v57 = vsel %vm434_vm4, %v690_v45, %v3844_v49  ;;  %v1015_v49 = vsel %vm424_vm1, %v3606_v61, %v3966_v4  ;;  %v1323_v4 = vpack.c.b16 %v1322_v26, %v1322_v26  ;;  %v1343_v28 = vpack.c.b16 %v1342_v3, %v1342_v3 }
 0x198   : > { %v694_v23 = vsel %vm437_vm5, %v692_v57, %v3876_v41  ;;  %v1017_v15 = vsel %vm428_vm2, %v1015_v49, %v3968_v21  ;;  %v1297_v21 = vunpack.c.l.b16 %v1219_v22  ;;  %v1338_v57 = vpack.c.b16 %v1337_v53, %v1337_v53 }
 0x199   : > { %v696_v50 = vsel %vm440_vm6, %v694_v23, %v3983_v62  ;;  %2562 = vrot.lane.b32.xlu2 %v3903_v52, %s3265_s14 }
 0x19a   : > { %v698_v41 = vsel %vm443_vm7, %v696_v50, %v3986_v31  ;;  %v1019_v31 = vsel %vm431_vm3, %v1017_v15, %v4019_v37  ;;  %v1307_v37 = vunpack.c.l.b16 %v1223_v36  ;;  %v1298_v20 = vpack.c.b16 %v1297_v21, %v1297_v21 }
 0x19b   : > { %1294 = vrot.lane.b32.xlu0 %v1293_v11, %s3257_s6  ;;  %v721_v62 = vsel %vm720_vm8, %v698_v41, 0  ;;  %v1285_v9 = vpop.permute.xlu2 %1284 }
 0x19c   : > { %732 = vmatpush.bf16.msra.mxu0 %v721_v62  ;;  %1304 = vrot.lane.b32.xlu1 %v1303_v58, %s3262_s11 }
 0x19d   : > { %v982_v61 = vpop.permute.xlu0 %981 }
 0x19e   : > { %v1280_v25 = vpop.permute.xlu1 %1279  ;;  %v1021_v43 = vsel %vm434_vm4, %v1019_v31, %v982_v61 }
 0x19f   : > { %v1348_v0 = vsel %vm424_vm1, %v3780_v59, %v1280_v25  ;;  %v1023_v40 = vsel %vm437_vm5, %v1021_v43, %v987_v51  ;;  %v1308_v51 = vpack.c.b16 %v1307_v37, %v1307_v37 }
 0x1a0   : > { %1044 = vmatpush.bf16.msrb.mxu0 %v1033_v12  ;;  %v1350_v60 = vsel %vm428_vm2, %v1348_v0, %v1285_v9  ;;  %v1025_v46 = vsel %vm440_vm6, %v1023_v40, %v992_v1 }
 0x1a1   : > { %1324 = vrot.lane.b32.xlu2 %v1323_v4, %s3263_s12 }
 0x1a3   : > { %1334 = vrot.lane.b32.xlu0 %v1333_v42, %s3259_s8  ;;  %v1424_v38 = vpop.permute.xlu2 %1423 }
 0x1a4   : > { %1344 = vrot.lane.b32.xlu1 %v1343_v28, %s3261_s10  ;;  %v1450_v58 = vshrl.u32 %v1424_v38, 16 }
 0x1a5   : > { %v997_v59 = vpop.permute.xlu0 %996 }
 0x1a6   : > { %v1422_v27 = vpop.permute.xlu1 %1421  ;;  %v1027_v44 = vsel %vm443_vm7, %v1025_v46, %v997_v59 }
 0x1a7   : > { %v1035_v45 = vsel %vm720_vm8, %v1027_v44, 0  ;;  %v1438_v26 = vshrl.u32 %v1422_v27, 16 }
 0x1a8   : > { %1057 = vmatpush.bf16.msrb.mxu1 %v1035_v45 }
 0x1a9   : > { %1299 = vrot.lane.b32.xlu2 %v1298_v20, %s3259_s8 }
 0x1ab   : > { %1309 = vrot.lane.b32.xlu0 %v1308_v51, %s3261_s10  ;;  %v1414_v55 = vpop.permute.xlu2 %1413 }
 0x1ac   : > { %v1432_v50 = vshrl.u32 %v1414_v55, 16 }
 0x1ad   : > { %v1290_v5 = vpop.permute.xlu0 %1289 }
 0x1ae   : > { %v4097_v1 = vsel %vm431_vm3, %v1350_v60, %v1290_v5  ;;  %v1428_v11 = vpop.permute.xlu1 %1427 }
 0x1af   : > { %v1451_v22 = vshrl.u32 %v1428_v11, 16  ;;  %v1449_v9 = vpack.i.b16 %v1428_v11, %v1424_v38 }
 0x1b1   : > { %1339 = vrot.lane.b32.xlu2 %v1338_v57, %s3262_s11  ;;  %v1452_v3 = vpack.i.b16 %v1451_v22, %v1450_v58  ;;  %v1514_v0 = vperm.slane %v1449_v9, %v3348_v2 }
 0x1b3   : > { %v1420_v23 = vpop.permute.xlu2 %1419  ;;  %v1540_v28 = vperm.slane %v1452_v3, %v3348_v2 }
 0x1b4   : > { %v1445_v36 = vshrl.u32 %v1420_v23, 16 }
 0x1b5   : > { %v1426_v6 = vpop.permute.xlu0 %1425  ;;  %v1541_v45 = vrot.slane %v1540_v28, 4 }
 0x1b6   : > { %v1437_v8 = vpack.i.b16 %v1426_v6, %v1422_v27  ;;  %v1439_v49 = vshrl.u32 %v1426_v6, 16  ;;  %v1418_v41 = vpop.permute.xlu1 %1417  ;;  %v1515_v27 = vrot.slane %v1514_v0, 4 }
 0x1b7   : > { %v1431_v62 = vpack.i.b16 %v1418_v41, %v1414_v55  ;;  %v1433_v14 = vshrl.u32 %v1418_v41, 16 }
 0x1b8   : > { %v1440_v12 = vpack.i.b16 %v1439_v49, %v1438_v26  ;;  %v1462_v7 = vperm.slane %v1437_v8, %v3348_v2 }
 0x1b9   : > { %v1434_v15 = vpack.i.b16 %v1433_v14, %v1432_v50  ;;  %v1457_v61 = vperm.slane %v1431_v62, %v3348_v2 }
 0x1ba   : > { %v1463_v4 = vrot.slane %v1462_v7, 4  ;;  %v1488_v31 = vperm.slane %v1440_v12, %v3348_v2 }
 0x1bb   : > { %v1483_v25 = vperm.slane %v1434_v15, %v3348_v2  ;;  %v4104_v43 = vpop.permute.xlu2 %1706  ;;  %v1465_v55 = vrot.slane %v1457_v61, 4 }
 0x1bc   : > { %v1489_v42 = vrot.slane %v1488_v31, 4  ;;  %v1464_v60 = vsel %vm260_vm0, %v1463_v4, %v1457_v61 }
 0x1bd   : > { %v1416_v21 = vpop.permute.xlu0 %1415  ;;  %v4110_v40 = vperm.slane %v1464_v60, %v3376_v18  ;;  %v1491_v8 = vrot.slane %v1483_v25, 4  ;;  %v1466_v12 = vsel %vm260_vm0, %v1462_v7, %v1465_v55 }
 0x1be   : > { %v1443_v24 = vpack.i.b16 %v1420_v23, %v1416_v21  ;;  %v1444_v37 = vshrl.u32 %v1416_v21, 16  ;;  %v4112_v38 = vpop.permute.xlu1 %1704  ;;  %v1490_v59 = vsel %vm260_vm0, %v1489_v42, %v1483_v25 }
 0x1bf   : > { %v1496_v46 = vperm.slane %v1490_v59, %v3376_v18  ;;  %v1475_v20 = vrot.slane %v4110_v40, 4  ;;  %v1492_v21 = vsel %vm260_vm0, %v1488_v31, %v1491_v8 }
 0x1c0   : > { %v1446_v44 = vpack.i.b16 %v1445_v36, %v1444_v37  ;;  %v1509_v48 = vperm.slane %v1443_v24, %v3348_v2  ;;  %v4140_v36 = vperm.slane %v1466_v12, %v3376_v18 }
 0x1c1   : > { %v1558_v51 = vunpack.c.l.b16 %v1496_v46  ;;  %v1476_v53 = vsel %vm260_vm0, 0, %v1475_v20  ;;  %v1501_v9 = vrot.slane %v1496_v46, 4 }
 0x1c2   : > { %v1516_v5 = vsel %vm260_vm0, %v1515_v27, %v1509_v48  ;;  %v1535_v57 = vperm.slane %v1446_v44, %v3348_v2  ;;  %v1563_v11 = vunpack.c.l.b16 %v1476_v53  ;;  %v1517_v50 = vrot.slane %v1509_v48, 4 }
 0x1c3   : > { %v1559_v23 = vpack.c.b16 %v1558_v51, %v1558_v51  ;;  %v4122_v58 = vperm.slane %v1516_v5, %v3376_v18  ;;  %v4124_v22 = vpop.permute.xlu2 %1696  ;;  %v1502_v7 = vsel %vm260_vm0, 0, %v1501_v9  ;;  %v1720_v27 = vshrl.u32 %v4104_v43, 16 }
 0x1c4   : > { %v1564_v6 = vpack.c.b16 %v1563_v11, %v1563_v11  ;;  %v1542_v26 = vsel %vm260_vm0, %v1541_v45, %v1535_v57  ;;  %v1518_v25 = vsel %vm260_vm0, %v1514_v0, %v1517_v50  ;;  %v1543_v24 = vrot.slane %v1535_v57, 4 }
 0x1c5   : > { %1560 = vrot.lane.b32.xlu2 %v1559_v23, %s3258_s7  ;;  %v4128_v49 = vpop.permute.xlu0 %1702  ;;  %v1548_v41 = vperm.slane %v1542_v26, %v3376_v18  ;;  %v1527_v62 = vrot.slane %v4122_v58, 4  ;;  %v1526_v20 = vperm.slane %v1518_v25, %v3376_v18  ;;  %v1500_v48 = vperm.slane %v1492_v21, %v3376_v18 }
 0x1c6   : > { %1565 = vrot.lane.b32.xlu1 %v1564_v6, %s3260_s9  ;;  %v4133_v14 = vpop.permute.xlu1 %1694  ;;  %v1719_v0 = vshrl.u32 %v4128_v49, 16  ;;  %v1568_v45 = vunpack.c.l.b16 %v1502_v7  ;;  %v1573_v55 = vunpack.c.l.b16 %v4140_v36  ;;  %v1544_v5 = vsel %vm260_vm0, %v1540_v28, %v1543_v24 }
 0x1c7   : > { %v1593_v3 = vunpack.c.l.b16 %v1548_v41  ;;  %v1528_v15 = vsel %vm260_vm0, 0, %v1527_v62  ;;  %v1553_v61 = vrot.slane %v1548_v41, 4  ;;  %v1529_v57 = vrot.slane %v1526_v20, 4 }
 0x1c8   : > { %v1598_v4 = vunpack.c.l.b16 %v1528_v15  ;;  %v1731_v11 = vshrl.u32 %v4112_v38, 16  ;;  %v1721_v23 = vpack.i.b16 %v1720_v27, %v1719_v0  ;;  %v1578_v6 = vunpack.c.l.b16 %v1500_v48 }
 0x1c9   : > { %v1594_v42 = vpack.c.b16 %v1593_v3, %v1593_v3  ;;  %v1554_v60 = vsel %vm260_vm0, 0, %v1553_v61  ;;  %v1569_v8 = vpack.c.b16 %v1568_v45, %v1568_v45  ;;  %v4161_v41 = vperm.slane %v1544_v5, %v3376_v18 }
 0x1ca   : > { %v1599_v37 = vpack.c.b16 %v1598_v4, %v1598_v4  ;;  %v1603_v59 = vunpack.c.l.b16 %v1554_v60  ;;  %v1574_v62 = vpack.c.b16 %v1573_v55, %v1573_v55  ;;  %v1477_v9 = vrot.slane %v4140_v36, 4 }
 0x1cb   : > { %1595 = vrot.lane.b32.xlu0 %v1594_v42, %s3258_s7  ;;  %v4145_v46 = vpop.permute.xlu2 %2283  ;;  %v1718_v12 = vpack.i.b16 %v4104_v43, %v4128_v49  ;;  %v1725_v28 = vshrl.u32 %v4124_v22, 16  ;;  %v1530_v15 = vsel %vm260_vm0, 0, %v1529_v57  ;;  %v4173_v61 = vperm.slane %v1721_v23, %v3348_v2 }
 0x1cc   : > { %v1604_v44 = vpack.c.b16 %v1603_v59, %v1603_v59  ;;  %v1713_v4 = vshrl.u32 %v4133_v14, 16  ;;  %v1579_v42 = vpack.c.b16 %v1578_v6, %v1578_v6  ;;  %v1608_v49 = vunpack.c.l.b16 %v1526_v20 }
 0x1cd   : > { %1600 = vrot.lane.b32.xlu2 %v1599_v37, %s3260_s9  ;;  %v1709_v31 = vpop.permute.xlu0 %1708  ;;  %v1613_v36 = vunpack.c.l.b16 %v4161_v41  ;;  %v1618_v59 = vunpack.c.l.b16 %v1530_v15  ;;  %v1503_v7 = vrot.slane %v1500_v48, 4  ;;  %v4190_v20 = vperm.slane %v2018_v13, %v3348_v2 }
 0x1ce   : > { %v1730_v51 = vpack.i.b16 %v1709_v31, %v4112_v38  ;;  %1605 = vrot.lane.b32.xlu1 %v1604_v44, %s3263_s12  ;;  %v1701_v53 = vpop.permute.xlu1 %1700  ;;  %v1732_v50 = vshrl.u32 %v1709_v31, 16  ;;  %v4196_v48 = vperm.slane %v1718_v12, %v3348_v2  ;;  %v1609_v55 = vpack.c.b16 %v1608_v49, %v1608_v49 }
 0x1cf   : > { %v1724_v38 = vpack.i.b16 %v1701_v53, %v4124_v22  ;;  %v2300_v22 = vshrl.u32 %v4145_v46, 16  ;;  %v1726_v21 = vshrl.u32 %v1701_v53, 16  ;;  %v1478_v30 = vsel %vm260_vm0, 0, %v1477_v9 }
 0x1d0   : > { %v4158_v26 = vperm.slane %v1730_v51, %v3348_v2  ;;  %v1733_v25 = vpack.i.b16 %v1732_v50, %v1731_v11  ;;  %v1614_v13 = vpack.c.b16 %v1613_v36, %v1613_v36  ;;  %v1619_v11 = vpack.c.b16 %v1618_v59, %v1618_v59 }
 0x1d1   : > { %v4182_v0 = vperm.slane %v1724_v38, %v3348_v2  ;;  %v1727_v5 = vpack.i.b16 %v1726_v21, %v1725_v28  ;;  %v1504_v23 = vsel %vm260_vm0, 0, %v1503_v7  ;;  %v1744_v9 = vrot.slane %v4196_v48, 4 }
 0x1d2   : > { %v1796_v60 = vrot.slane %v4158_v26, 4  ;;  %v4193_v45 = vperm.slane %v1733_v25, %v3348_v2  ;;  %v1583_v38 = vunpack.c.l.b16 %v1478_v30  ;;  %v4229_v49 = vperm.slane %v3874_v17, %v3348_v2 }
 0x1d3   : > { %1570 = vrot.lane.b32.xlu0 %v1569_v8, %s3263_s12  ;;  %v4169_v3 = vpop.permute.xlu2 %2289  ;;  %v1816_v25 = vperm.slane %v1727_v5, %v3348_v2  ;;  %v1588_v21 = vunpack.c.l.b16 %v1504_v23  ;;  %v1798_v59 = vrot.slane %v4182_v0, 4  ;;  %v4242_v17 = vperm.slane %v2024_v35, %v3348_v2 }
 0x1d4   : > { %v1797_v53 = vsel %vm260_vm0, %v1796_v60, %v4182_v0  ;;  %v1822_v6 = vrot.slane %v4193_v45, 4  ;;  %v2313_v8 = vshrl.u32 %v4169_v3, 16 }
 0x1d5   : > { %1575 = vrot.lane.b32.xlu2 %v1574_v62, %s3257_s6  ;;  %v1699_v43 = vpop.permute.xlu0 %1698  ;;  %v4213_v12 = vperm.slane %v1797_v53, %v3376_v18  ;;  %v1589_v29 = vpack.c.b16 %v1588_v21, %v1588_v21  ;;  %v1824_v5 = vrot.slane %v1816_v25, 4 }
 0x1d6   : > { %v1714_v24 = vshrl.u32 %v1699_v43, 16  ;;  %1580 = vrot.lane.b32.xlu1 %v1579_v42, %s3259_s8  ;;  %v2288_v37 = vpop.permute.xlu1 %2287  ;;  %v1712_v27 = vpack.i.b16 %v1699_v43, %v4133_v14 }
 0x1d7   : > { %v2299_v44 = vpack.i.b16 %v2288_v37, %v4145_v46  ;;  %v2301_v31 = vshrl.u32 %v2288_v37, 16  ;;  %v1770_v46 = vrot.slane %v4173_v61, 4  ;;  %v1823_v37 = vsel %vm260_vm0, %v1822_v6, %v1816_v25 }
 0x1d8   : > { %v1715_v51 = vpack.i.b16 %v1714_v24, %v1713_v4  ;;  %v1738_v63 = vperm.slane %v1712_v27, %v3348_v2  ;;  %v1555_v4 = vrot.slane %v4161_v41, 4  ;;  %v1584_v27 = vpack.c.b16 %v1583_v38, %v1583_v38 }
 0x1d9   : > { %v2302_v14 = vpack.i.b16 %v2301_v31, %v2300_v22  ;;  %v2044_v22 = vrot.slane %v4190_v20, 4  ;;  %v2324_v7 = vperm.slane %v2299_v44, %v3348_v2  ;;  %v4255_v44 = vperm.slane %v3915_v47, %v3348_v2 }
 0x1da   : > { %v4202_v57 = vperm.slane %v1715_v51, %v3348_v2  ;;  %v1745_v36 = vsel %vm260_vm0, %v1744_v9, %v1738_v63  ;;  %v1556_v31 = vsel %vm260_vm0, 0, %v1555_v4  ;;  %v4248_v51 = vperm.slane %v2030_v56, %v3348_v2 }
 0x1db   : > { %1610 = vrot.lane.b32.xlu0 %v1609_v55, %s3257_s6  ;;  %v2280_v50 = vpop.permute.xlu2 %2279  ;;  %v1746_v53 = vrot.slane %v1738_v63, 4  ;;  %v4251_v0 = vperm.slane %v1745_v36, %v3376_v18  ;;  %v4259_v55 = vperm.slane %v3913_v54, %v3348_v2  ;;  %v4263_v52 = vperm.slane %v1823_v37, %v3376_v18 }
 0x1dc   : > { %v1771_v62 = vsel %vm260_vm0, %v1770_v46, %v4202_v57  ;;  %v2295_v34 = vshrl.u32 %v2280_v50, 16  ;;  %v1623_v35 = vunpack.c.l.b16 %v1556_v31  ;;  %v2325_v47 = vrot.slane %v2324_v7, 4 }
 0x1dd   : > { %1615 = vrot.lane.b32.xlu2 %v1614_v13, %s3259_s8  ;;  %v2286_v28 = vpop.permute.xlu0 %2285  ;;  %v4218_v15 = vperm.slane %v1771_v62, %v3376_v18  ;;  %v4269_v30 = vperm.slane %v2302_v14, %v3348_v2  ;;  %v1799_v63 = vsel %vm260_vm0, %v4158_v26, %v1798_v59  ;;  %v1756_v6 = vrot.slane %v4251_v0, 4 }
 0x1de   : > { %v2312_v42 = vshrl.u32 %v2286_v28, 16  ;;  %v2311_v60 = vpack.i.b16 %v4169_v3, %v2286_v28  ;;  %1620 = vrot.lane.b32.xlu1 %v1619_v11, %s3262_s11  ;;  %v4224_v43 = vpop.permute.xlu1 %2277  ;;  %v1808_v3 = vrot.slane %v4213_v12, 4  ;;  %v4284_v14 = vperm.slane %v2012_v19, %v3348_v2 }
 0x1df   : > { %v1839_v41 = vunpack.c.l.b16 %v4218_v15  ;;  %v4288_v26 = vperm.slane %v3936_v39, %v3348_v2  ;;  %v1624_v38 = vpack.c.b16 %v1623_v35, %v1623_v35  ;;  %v1782_v4 = vrot.slane %v4218_v15, 4 }
 0x1e0   : > { %v2314_v24 = vpack.i.b16 %v2313_v8, %v2312_v42  ;;  %v1809_v46 = vsel %vm260_vm0, 0, %v1808_v3  ;;  %v1747_v8 = vsel %vm260_vm0, %v4196_v48, %v1746_v53  ;;  %v2351_v48 = vrot.slane %v4269_v30, 4 }
 0x1e1   : > { %v1840_v56 = vpack.c.b16 %v1839_v41, %v1839_v41  ;;  %v1879_v62 = vunpack.c.l.b16 %v1809_v46  ;;  %v4295_v25 = vperm.slane %v1747_v8, %v3376_v18  ;;  %v4298_v33 = vperm.slane %v1799_v63, %v3376_v18 }
 0x1e2   : > { %v1825_v32 = vsel %vm260_vm0, %v4193_v45, %v1824_v5  ;;  %v2376_v19 = vperm.slane %v2311_v60, %v3348_v2  ;;  %v1757_v36 = vsel %vm260_vm0, 0, %v1756_v6  ;;  %v1772_v15 = vrot.slane %v4202_v57, 4 }
 0x1e3   : > { %1585 = vrot.lane.b32.xlu0 %v1584_v27, %s3262_s11  ;;  %v4265_v16 = vpop.permute.xlu2 %2566  ;;  %v1880_v37 = vpack.c.b16 %v1879_v62, %v1879_v62  ;;  %v4313_v3 = vperm.slane %v2314_v24, %v3348_v2  ;;  %v2306_v45 = vshrl.u32 %v4224_v43, 16  ;;  %v1783_v59 = vsel %vm260_vm0, 0, %v1782_v4 }
 0x1e4   : > { %v2593_v27 = vshrl.u32 %v4265_v16, 16  ;;  %v1844_v31 = vunpack.c.l.b16 %v1757_v36  ;;  %v1854_v46 = vunpack.c.l.b16 %v4295_v25  ;;  %v2122_v63 = vrot.slane %v4259_v55, 4 }
 0x1e5   : > { %1590 = vrot.lane.b32.xlu2 %v1589_v29, %s3261_s10  ;;  %v2276_v54 = vpop.permute.xlu0 %2275  ;;  %v1834_v29 = vrot.slane %v4263_v52, 4  ;;  %v2070_v6 = vrot.slane %v4229_v49, 4 }
 0x1e6   : > { %v2294_v13 = vshrl.u32 %v2276_v54, 16  ;;  %v2293_v11 = vpack.i.b16 %v2280_v50, %v2276_v54  ;;  %1841 = vrot.lane.b32.xlu1 %v1840_v56, %s3258_s7  ;;  %v4275_v23 = vpop.permute.xlu1 %2564  ;;  %v1874_v50 = vunpack.c.l.b16 %v4263_v52  ;;  %v1849_v54 = vunpack.c.l.b16 %v1783_v59 }
 0x1e7   : > { %v2403_v52 = vrot.slane %v4313_v3, 4  ;;  %v1845_v8 = vpack.c.b16 %v1844_v31, %v1844_v31  ;;  %v4338_v62 = vsel %vm260_vm0, %v2122_v63, %v4255_v44  ;;  %v4354_v36 = vsel %vm260_vm0, %v2070_v6, %v4288_v26 }
 0x1e8   : > { %v2296_v9 = vpack.i.b16 %v2295_v34, %v2294_v13  ;;  %v2319_v28 = vperm.slane %v2293_v11, %v3348_v2  ;;  %v1875_v41 = vpack.c.b16 %v1874_v50, %v1874_v50  ;;  %v2377_v34 = vrot.slane %v2376_v19, 4 }
 0x1e9   : > { %v1835_v50 = vsel %vm260_vm0, 0, %v1834_v29  ;;  %v1850_v4 = vpack.c.b16 %v1849_v54, %v1849_v54  ;;  %v1758_v54 = vrot.slane %v4295_v25, 4  ;;  %v2046_v63 = vrot.slane %v4284_v14, 4 }
 0x1ea   : > { %v4304_v39 = vsel %vm260_vm0, %v2325_v47, %v2319_v28  ;;  %v2327_v42 = vrot.slane %v2319_v28, 4  ;;  %v4309_v21 = vperm.slane %v2296_v9, %v3348_v2 }
 0x1eb   : > { %1625 = vrot.lane.b32.xlu0 %v1624_v38, %s3261_s10  ;;  %v2557_v53 = vpop.permute.xlu2 %2556  ;;  %v1773_v38 = vsel %vm260_vm0, %v4173_v61, %v1772_v15  ;;  %v1884_v61 = vunpack.c.l.b16 %v1835_v50  ;;  %v2096_v15 = vrot.slane %v4248_v51, 4 }
 0x1ec   : > { %v4317_v60 = vsel %vm260_vm0, %v2324_v7, %v2327_v42  ;;  %v4325_v24 = vsel %vm260_vm0, %v2351_v48, %v4309_v21  ;;  %v1855_v48 = vpack.c.b16 %v1854_v46, %v1854_v46  ;;  %v4350_v42 = vperm.slane %v1825_v32, %v3376_v18 }
 0x1ed   : > { %1876 = vrot.lane.b32.xlu2 %v1875_v41, %s3258_s7  ;;  %v2282_v57 = vpop.permute.xlu0 %2281  ;;  %v2581_v41 = vshrl.u32 %v4275_v23, 16  ;;  %v2575_v59 = vshrl.u32 %v2557_v53, 16 }
 0x1ee   : > { %v2305_v56 = vpack.i.b16 %v2282_v57, %v4224_v43  ;;  %v2307_v7 = vshrl.u32 %v2282_v57, 16  ;;  %1881 = vrot.lane.b32.xlu1 %v1880_v37, %s3260_s9  ;;  %v2571_v35 = vpop.permute.xlu1 %2570  ;;  %v1781_v57 = vperm.slane %v1773_v38, %v3376_v18 }
 0x1ef   : > { %v2592_v5 = vpack.i.b16 %v2571_v35, %v4265_v16  ;;  %v2594_v47 = vshrl.u32 %v2571_v35, 16 }
 0x1f0   : > { %v2308_v13 = vpack.i.b16 %v2307_v7, %v2306_v45  ;;  %v2371_v11 = vperm.slane %v2305_v56, %v3348_v2  ;;  %v1889_v56 = vunpack.c.l.b16 %v4298_v33  ;;  %v1784_v6 = vrot.slane %v1781_v57, 4 }
 0x1f1   : > { %v2595_v43 = vpack.i.b16 %v2594_v47, %v2593_v27  ;;  %v2045_v27 = vsel %vm260_vm0, %v2044_v22, %v4284_v14  ;;  %v1894_v47 = vunpack.c.l.b16 %v4350_v42 }
 0x1f2   : > { %v4341_v16 = vsel %vm260_vm0, %v2377_v34, %v2371_v11  ;;  %v2379_v9 = vrot.slane %v2371_v11, 4  ;;  %v4344_v28 = vperm.slane %v2308_v13, %v3348_v2  ;;  %v1885_v13 = vpack.c.b16 %v1884_v61, %v1884_v61 }
 0x1f3   : > { %1846 = vrot.lane.b32.xlu0 %v1845_v8, %s3260_s9  ;;  %v2563_v46 = vpop.permute.xlu2 %2562  ;;  %v2097_v8 = vsel %vm260_vm0, %v2096_v15, %v4242_v17  ;;  %v1890_v25 = vpack.c.b16 %v1889_v56, %v1889_v56  ;;  %v4387_v14 = vperm.slane %v2595_v43, %v3348_v2 }
 0x1f4   : > { %v4358_v37 = vsel %vm260_vm0, %v2376_v19, %v2379_v9  ;;  %v4362_v45 = vsel %vm260_vm0, %v2403_v52, %v4344_v28  ;;  %v2098_v19 = vrot.slane %v4242_v17, 4  ;;  %v2588_v61 = vshrl.u32 %v2563_v46, 16 }
 0x1f5   : > { %1851 = vrot.lane.b32.xlu2 %v1850_v4, %s3263_s12  ;;  %v2569_v32 = vpop.permute.xlu0 %2568  ;;  %v1895_v4 = vpack.c.b16 %v1894_v47, %v1894_v47 }
 0x1f6   : > { %v2580_v31 = vpack.i.b16 %v2569_v32, %v4275_v23  ;;  %v2582_v29 = vshrl.u32 %v2569_v32, 16  ;;  %1856 = vrot.lane.b32.xlu1 %v1855_v48, %s3257_s6  ;;  %v2561_v34 = vpop.permute.xlu1 %2560  ;;  %v1759_v48 = vsel %vm260_vm0, 0, %v1758_v54  ;;  %v1859_v32 = vunpack.c.l.b16 %v1781_v57 }
 0x1f7   : > { %v2574_v7 = vpack.i.b16 %v2561_v34, %v2557_v53  ;;  %v2576_v35 = vshrl.u32 %v2561_v34, 16  ;;  %v2657_v53 = vperm.slane %v2592_v5, %v3348_v2  ;;  %v1864_v47 = vunpack.c.l.b16 %v1759_v48 }
 0x1f8   : > { %v2583_v22 = vpack.i.b16 %v2582_v29, %v2581_v41  ;;  %v2605_v52 = vperm.slane %v2580_v31, %v3348_v2  ;;  %v1810_v31 = vrot.slane %v4298_v33, 4  ;;  %v1836_v54 = vrot.slane %v4350_v42, 4 }
 0x1f9   : > { %v2577_v23 = vpack.i.b16 %v2576_v35, %v2575_v59  ;;  %v2600_v11 = vperm.slane %v2574_v7, %v3348_v2  ;;  %v1785_v59 = vsel %vm260_vm0, 0, %v1784_v6  ;;  %v2658_v29 = vrot.slane %v2657_v53, 4 }
 0x1fa   : > { %v2606_v50 = vrot.slane %v2605_v52, 4  ;;  %v4384_v9 = vperm.slane %v2583_v22, %v3348_v2  ;;  %v4412_v57 = vsel %vm260_vm0, %v4248_v51, %v2098_v19  ;;  %v2684_v22 = vrot.slane %v4387_v14, 4 }
 0x1fb   : > { %v2608_v38 = vrot.slane %v2600_v11, 4  ;;  %1886 = vrot.lane.b32.xlu0 %v1885_v13, %s3263_s12  ;;  %v4396_v5 = vperm.slane %v2577_v23, %v3348_v2  ;;  %v1869_v13 = vunpack.c.l.b16 %v1785_v59  ;;  %v1860_v23 = vpack.c.b16 %v1859_v32, %v1859_v32 }
 0x1fc   : > { %v2632_v41 = vrot.slane %v4384_v9, 4  ;;  %v4393_v17 = vsel %vm260_vm0, %v2606_v50, %v2600_v11  ;;  %v1325_v11 = vpop.permute.xlu2 %1324  ;;  %v2129_v6 = vperm.slane %v4338_v62, %v3376_v18  ;;  %v2047_v42 = vsel %vm260_vm0, %v4190_v20, %v2046_v63 }
 0x1fd   : > { %v4399_v15 = vsel %vm260_vm0, %v2605_v52, %v2608_v38  ;;  %1891 = vrot.lane.b32.xlu2 %v1890_v25, %s3257_s6  ;;  %v2559_v43 = vpop.permute.xlu0 %2558  ;;  %v4428_v25 = vperm.slane %v2045_v27, %v3376_v18  ;;  %v1865_v38 = vpack.c.b16 %v1864_v47, %v1864_v47  ;;  %v1870_v63 = vpack.c.b16 %v1869_v13, %v1869_v13 }
 0x1fe   : > { %v4406_v34 = vsel %vm260_vm0, %v2632_v41, %v4396_v5  ;;  %v2587_v56 = vshrl.u32 %v2559_v43, 16  ;;  %v2586_v7 = vpack.i.b16 %v2563_v46, %v2559_v43  ;;  %1896 = vrot.lane.b32.xlu1 %v1895_v4, %s3259_s8  ;;  %v1320_v35 = vpop.permute.xlu1 %1319  ;;  %v1811_v46 = vsel %vm260_vm0, 0, %v1810_v31 }
 0x1ff   : > { %v2077_v4 = vperm.slane %v4354_v36, %v3376_v18  ;;  %v1899_v48 = vunpack.c.l.b16 %v1811_v46  ;;  %v2072_v41 = vrot.slane %v4288_v26, 4  ;;  %v2174_v36 = vunpack.c.l.b16 %v2129_v6 }
 0x200   : > { %v2589_v33 = vpack.i.b16 %v2588_v61, %v2587_v56  ;;  %v2652_v52 = vperm.slane %v2586_v7, %v3348_v2  ;;  %v4448_v31 = vperm.slane %v2097_v8, %v3376_v18  ;;  %v2405_v13 = vrot.slane %v4344_v28, 4 }
 0x201   : > { %v2082_v32 = vrot.slane %v2077_v4, 4  ;;  %v2073_v59 = vsel %vm260_vm0, %v4229_v49, %v2072_v41  ;;  %v1900_v56 = vpack.c.b16 %v1899_v48, %v1899_v48  ;;  %v2175_v7 = vpack.c.b16 %v2174_v36, %v2174_v36 }
 0x202   : > { %v4422_v50 = vsel %vm260_vm0, %v2658_v29, %v2652_v52  ;;  %v2660_v51 = vrot.slane %v2652_v52, 4  ;;  %v4425_v19 = vperm.slane %v2589_v33, %v3348_v2  ;;  %v1837_v2 = vsel %vm260_vm0, 0, %v1836_v54 }
 0x203   : > { %1861 = vrot.lane.b32.xlu0 %v1860_v23, %s3259_s8  ;;  %v1904_v43 = vunpack.c.l.b16 %v1837_v2  ;;  %v2124_v29 = vrot.slane %v4255_v44, 4  ;;  %v2139_v49 = vunpack.c.l.b16 %v2077_v4  ;;  %v2083_v8 = vsel %vm260_vm0, 0, %v2082_v32 }
 0x204   : > { %v4434_v62 = vsel %vm260_vm0, %v2657_v53, %v2660_v51  ;;  %v4438_v20 = vsel %vm260_vm0, %v2684_v22, %v4425_v19  ;;  %v2056_v53 = vrot.slane %v4428_v25, 4  ;;  %v1300_v33 = vpop.permute.xlu2 %1299  ;;  %v2108_v52 = vrot.slane %v4448_v31, 4 }
 0x205   : > { %1866 = vrot.lane.b32.xlu2 %v1865_v38, %s3262_s11  ;;  %v1315_v27 = vpop.permute.xlu0 %1314  ;;  %v2125_v54 = vsel %vm260_vm0, %v4259_v55, %v2124_v29  ;;  %v1905_v22 = vpack.c.b16 %v1904_v43, %v1904_v43  ;;  %v2353_v44 = vrot.slane %v4309_v21, 4  ;;  %v2149_v51 = vunpack.c.l.b16 %v2083_v8 }
 0x206   : > { %1871 = vrot.lane.b32.xlu1 %v1870_v63, %s3261_s10  ;;  %v1330_v61 = vpop.permute.xlu1 %1329  ;;  %v1363_v26 = vsel %vm424_vm1, %v3976_v10, %v1315_v27  ;;  %v2057_v47 = vsel %vm260_vm0, 0, %v2056_v53  ;;  %v2134_v38 = vrot.slane %v2129_v6, 4  ;;  %v2140_v4 = vpack.c.b16 %v2139_v49, %v2139_v49 }
 0x207   : > { %v1365_v10 = vsel %vm428_vm2, %v1363_v26, %v1320_v35  ;;  %v2144_v46 = vunpack.c.l.b16 %v2057_v47  ;;  %v2109_v2 = vsel %vm260_vm0, 0, %v2108_v52  ;;  %v4468_v21 = vsel %vm260_vm0, %v4269_v30, %v2353_v44 }
 0x208   : > { %v1367_v63 = vsel %vm431_vm3, %v1365_v10, %v1325_v11  ;;  %v4472_v28 = vsel %vm260_vm0, %v4313_v3, %v2405_v13  ;;  %v2150_v35 = vpack.c.b16 %v2149_v51, %v2149_v51  ;;  %v2135_v48 = vsel %vm260_vm0, 0, %v2134_v38 }
 0x209   : > { %v2145_v27 = vpack.c.b16 %v2144_v46, %v2144_v46  ;;  %v2107_v6 = vperm.slane %v4412_v57, %v3376_v18  ;;  %v1369_v41 = vsel %vm434_vm4, %v1367_v63, %v1330_v61  ;;  %v2179_v11 = vunpack.c.l.b16 %v2109_v2 }
 0x20a   : > { %v2055_v36 = vperm.slane %v2047_v42, %v3376_v18  ;;  %v2184_v43 = vunpack.c.l.b16 %v2135_v48  ;;  %v2081_v47 = vperm.slane %v2073_v59, %v3376_v18  ;;  %v2133_v44 = vperm.slane %v2125_v54, %v3376_v18 }
 0x20b   : > { %1901 = vrot.lane.b32.xlu0 %v1900_v56, %s3262_s11  ;;  %v2189_v32 = vunpack.c.l.b16 %v2107_v6  ;;  %v2180_v56 = vpack.c.b16 %v2179_v11, %v2179_v11  ;;  %v2686_v13 = vrot.slane %v4425_v19, 4  ;;  %v2634_v10 = vrot.slane %v4396_v5, 4 }
 0x20c   : > { %v1340_v53 = vpop.permute.xlu2 %1339  ;;  %v2058_v26 = vrot.slane %v2055_v36, 4  ;;  %v2154_v52 = vunpack.c.l.b16 %v2055_v36  ;;  %v2159_v46 = vunpack.c.l.b16 %v2081_v47  ;;  %v2110_v38 = vrot.slane %v2107_v6, 4 }
 0x20d   : > { %1906 = vrot.lane.b32.xlu2 %v1905_v22, %s3261_s10  ;;  %v1295_v23 = vpop.permute.xlu0 %1294  ;;  %v2190_v8 = vpack.c.b16 %v2189_v32, %v2189_v32  ;;  %v2136_v19 = vrot.slane %v2133_v44, 4  ;;  %v4504_v5 = vsel %vm260_vm0, %v4387_v14, %v2686_v13  ;;  %v4508_v2 = vsel %vm260_vm0, %v4384_v9, %v2634_v10 }
 0x20e   : > { %2176 = vrot.lane.b32.xlu1 %v2175_v7, %s3258_s7  ;;  %v1305_v55 = vpop.permute.xlu1 %1304  ;;  %v1354_v57 = vsel %vm434_vm4, %v4097_v1, %v1295_v23  ;;  %v2185_v7 = vpack.c.b16 %v2184_v43, %v2184_v43  ;;  %v2059_v1 = vsel %vm260_vm0, 0, %v2058_v26  ;;  %v2155_v63 = vpack.c.b16 %v2154_v52, %v2154_v52 }
 0x20f   : > { %v1356_v49 = vsel %vm437_vm5, %v1354_v57, %v1300_v33  ;;  %v2164_v51 = vunpack.c.l.b16 %v2059_v1  ;;  %v2194_v48 = vunpack.c.l.b16 %v2133_v44  ;;  %v2137_v6 = vsel %vm260_vm0, 0, %v2136_v19 }
 0x210   : > { %v1358_v23 = vsel %vm440_vm6, %v1356_v49, %v1305_v55  ;;  %v2160_v55 = vpack.c.b16 %v2159_v46, %v2159_v46  ;;  %v4515_v11 = vperm.slane %v4304_v39, %v3376_v18  ;;  %v2204_v9 = vunpack.c.l.b16 %v2137_v6  ;;  %v3030_v46 = vld [vmem:[%s4848_s1 + $0x4] sm:$0xf] }
 0x211   : > { %v2358_v39 = vperm.slane %v4325_v24, %v3376_v18  ;;  %v4528_v57 = vperm.slane %v4341_v16, %v3376_v18  ;;  %3031 = vmatmul.msk.bf16.vlgmr.msra.gmra.mxu0 %vm716_vm15, %v3030_v46  ;;  %3032 = vmatmul.msk.bf16.vlgmr.msra.gmra.mxu1 %vm716_vm15, %v3030_v46 }
 0x212   : > { %v2205_v32 = vpack.c.b16 %v2204_v9, %v2204_v9 }
 0x213   : > { %2141 = vrot.lane.b32.xlu0 %v2140_v4, %s3258_s7  ;;  %v2389_v24 = vrot.slane %v4528_v57, 4  ;;  %v2363_v1 = vrot.slane %v2358_v39, 4 }
 0x215   : > { %2146 = vrot.lane.b32.xlu2 %v2145_v27, %s3260_s9  ;;  %v1335_v30 = vpop.permute.xlu0 %1334  ;;  %v2165_v27 = vpack.c.b16 %v2164_v51, %v2164_v51 }
 0x216   : > { %v1371_v3 = vsel %vm437_vm5, %v1369_v41, %v1335_v30  ;;  %2151 = vrot.lane.b32.xlu1 %v2150_v35, %s3263_s12  ;;  %v1345_v29 = vpop.permute.xlu1 %1344  ;;  %v2111_v35 = vsel %vm260_vm0, 0, %v2110_v38  ;;  %v2084_v41 = vrot.slane %v2081_v47, 4  ;;  %v2195_v30 = vpack.c.b16 %v2194_v48, %v2194_v48 }
 0x217   : > { %v1373_v61 = vsel %vm440_vm6, %v1371_v3, %v1340_v53  ;;  %v2199_v14 = vunpack.c.l.b16 %v2111_v35  ;;  %v2337_v3 = vrot.slane %v4515_v11, 4  ;;  %v2336_v38 = vperm.slane %v4317_v60, %v3376_v18 }
 0x218   : > { %v1375_v42 = vsel %vm443_vm7, %v1373_v61, %v1345_v29  ;;  %v2085_v53 = vsel %vm260_vm0, 0, %v2084_v41 }
 0x219   : > { %v1383_v22 = vsel %vm720_vm8, %v1375_v42, 0  ;;  %v2200_v43 = vpack.c.b16 %v2199_v14, %v2199_v14  ;;  %v2169_v29 = vunpack.c.l.b16 %v2085_v53  ;;  %v2338_v61 = vsel %vm260_vm0, 0, %v2337_v3 }
 0x21a   : > { %1405 = vmatpush.bf16.msrb.mxu3 %v1383_v22  ;;  %v2425_v47 = vunpack.c.l.b16 %v2338_v61  ;;  %v2435_v48 = vunpack.c.l.b16 %v2336_v38  ;;  %v2339_v3 = vrot.slane %v2336_v38, 4 }
 0x21b   : > { %2181 = vrot.lane.b32.xlu0 %v2180_v56, %s3260_s9  ;;  %v2410_v56 = vperm.slane %v4362_v45, %v3376_v18  ;;  %v2170_v42 = vpack.c.b16 %v2169_v29, %v2169_v29 }
 0x21c   : > { %v2426_v49 = vpack.c.b16 %v2425_v47, %v2425_v47  ;;  %v2436_v9 = vpack.c.b16 %v2435_v48, %v2435_v48 }
 0x21d   : > { %2186 = vrot.lane.b32.xlu2 %v2185_v7, %s3263_s12  ;;  %v1310_v59 = vpop.permute.xlu0 %1309  ;;  %v2420_v7 = vunpack.c.l.b16 %v2358_v39  ;;  %v2415_v22 = vrot.slane %v2410_v56, 4  ;;  %v2455_v52 = vunpack.c.l.b16 %v2410_v56 }
 0x21e   : > { %2191 = vrot.lane.b32.xlu1 %v2190_v8, %s3257_s6  ;;  %v1360_v33 = vsel %vm443_vm7, %v1358_v23, %v1310_v59  ;;  %v2390_v8 = vsel %vm260_vm0, 0, %v2389_v24 }
 0x21f   : > { %v4499_v4 = vpop.permute.xlu2 %1560  ;;  %v1381_v54 = vsel %vm720_vm8, %v1360_v33, 0  ;;  %v2421_v16 = vpack.c.b16 %v2420_v7, %v2420_v7  ;;  %v2416_v45 = vsel %vm260_vm0, 0, %v2415_v22  ;;  %v2460_v13 = vunpack.c.l.b16 %v2390_v8 }
 0x220   : > { %1392 = vmatpush.bf16.msrb.mxu2 %v1381_v54  ;;  %v2465_v23 = vunpack.c.l.b16 %v2416_v45  ;;  %v2456_v59 = vpack.c.b16 %v2455_v52, %v2455_v52  ;;  %v2364_v33 = vsel %vm260_vm0, 0, %v2363_v1  ;;  %v2340_v7 = vsel %vm260_vm0, 0, %v2339_v3  ;;  %v461_v3 = vld [vmem:[%s4848_s1] sm:$0xf] }
 0x221   : > { %v2461_v51 = vpack.c.b16 %v2460_v13, %v2460_v13  ;;  %v2639_v22 = vperm.slane %v4406_v34, %v3376_v18  ;;  %v2445_v52 = vunpack.c.l.b16 %v2340_v7  ;;  %3033 = vmatmul.msk.bf16.vlgmr.msra.gmra.mxu2 %vm716_vm15, %v461_v3  ;;  %3034 = vmatmul.msk.bf16.vlgmr.msra.gmra.mxu3 %vm716_vm15, %v461_v3 }
 0x222   : > { %v2466_v54 = vpack.c.b16 %v2465_v23, %v2465_v23 }
 0x223   : > { %2156 = vrot.lane.b32.xlu0 %v2155_v63, %s3257_s6  ;;  %v2362_v63 = vperm.slane %v4468_v21, %v3376_v18  ;;  %v2414_v21 = vperm.slane %v4472_v28, %v3376_v18  ;;  %v2701_v46 = vunpack.c.l.b16 %v2639_v22 }
 0x225   : > { %2161 = vrot.lane.b32.xlu2 %v2160_v55, %s3259_s8  ;;  %v2430_v55 = vunpack.c.l.b16 %v2364_v33  ;;  %v2440_v41 = vunpack.c.l.b16 %v2362_v63  ;;  %v2475_v29 = vunpack.c.l.b16 %v2414_v21  ;;  %v2365_v56 = vrot.slane %v2362_v63, 4 }
 0x226   : > { %2166 = vrot.lane.b32.xlu1 %v2165_v27, %s3262_s11  ;;  %v2388_v27 = vperm.slane %v4358_v37, %v3376_v18  ;;  %v2417_v1 = vrot.slane %v2414_v21, 4  ;;  %v4593_v33 = vperm.slane %v4393_v17, %v3376_v18  ;;  %v2702_v63 = vpack.c.b16 %v2701_v46, %v2701_v46 }
 0x227   : > { %v4519_v36 = vpop.permute.xlu2 %1600  ;;  %v2431_v14 = vpack.c.b16 %v2430_v55, %v2430_v55  ;;  %v2476_v28 = vpack.c.b16 %v2475_v29, %v2475_v29  ;;  %v2366_v24 = vsel %vm260_vm0, 0, %v2365_v56  ;;  %v2643_v46 = vperm.slane %v4508_v2, %v3376_v18 }
 0x228   : > { %v2391_v60 = vrot.slane %v2388_v27, 4  ;;  %v2470_v37 = vunpack.c.l.b16 %v2388_v27  ;;  %v2450_v23 = vunpack.c.l.b16 %v2366_v24 }
 0x22b   : > { %2196 = vrot.lane.b32.xlu0 %v2195_v30, %s3259_s8  ;;  %v2441_v30 = vpack.c.b16 %v2440_v41, %v2440_v41 }
 0x22d   : > { %2201 = vrot.lane.b32.xlu2 %v2200_v43, %s3262_s11  ;;  %v2392_v43 = vsel %vm260_vm0, 0, %v2391_v60 }
 0x22e   : > { %2206 = vrot.lane.b32.xlu1 %v2205_v32, %s3261_s10  ;;  %v2480_v61 = vunpack.c.l.b16 %v2392_v43 }
 0x22f   : > { %v4535_v26 = vpop.permute.xlu2 %1575 }
 0x230   : > { %v2481_v47 = vpack.c.b16 %v2480_v61, %v2480_v61  ;;  %v2617_v61 = vperm.slane %v4399_v15, %v3376_v18 }
 0x232   : > { %v2716_v15 = vunpack.c.l.b16 %v2617_v61 }
 0x233   : > { %2171 = vrot.lane.b32.xlu0 %v2170_v42, %s3261_s10  ;;  %v2471_v42 = vpack.c.b16 %v2470_v37, %v2470_v37 }
 0x235   : > { %2422 = vrot.lane.b32.xlu2 %v2421_v16, %s3258_s7  ;;  %v4577_v16 = vperm.slane %v4422_v50, %v3376_v18 }
 0x236   : > { %2427 = vrot.lane.b32.xlu1 %v2426_v49, %s3260_s9  ;;  %v1629_v49 = vsel %vm424_vm1, %v4110_v40, %v4499_v4  ;;  %v2446_v40 = vpack.c.b16 %v2445_v52, %v2445_v52 }
 0x237   : > { %v4543_v44 = vpop.permute.xlu2 %1615  ;;  %v2670_v4 = vrot.slane %v4577_v16, 4 }
 0x238   : > { %v1566_v10 = vpop.permute.xlu1 %1565 }
 0x239   : > { %v1631_v45 = vsel %vm428_vm2, %v1629_v49, %v1566_v10 }
 0x23b   : > { %2457 = vrot.lane.b32.xlu0 %v2456_v59, %s3258_s7 }
 0x23d   : > { %2462 = vrot.lane.b32.xlu2 %v2461_v51, %s3260_s9  ;;  %v1596_v19 = vpop.permute.xlu0 %1595  ;;  %v2418_v51 = vsel %vm260_vm0, 0, %v2417_v1  ;;  %v2669_v1 = vperm.slane %v4434_v62, %v3376_v18  ;;  %v2646_v62 = vrot.slane %v2643_v46, 4 }
 0x23e   : > { %2467 = vrot.lane.b32.xlu1 %v2466_v54, %s3263_s12  ;;  %v1644_v50 = vsel %vm424_vm1, %v4122_v58, %v1596_v19  ;;  %v2451_v58 = vpack.c.b16 %v2450_v23, %v2450_v23  ;;  %v2691_v54 = vperm.slane %v4438_v20, %v3376_v18  ;;  %v2485_v55 = vunpack.c.l.b16 %v2418_v51 }
 0x23f   : > { %v4560_v35 = vpop.permute.xlu2 %1590  ;;  %v1646_v38 = vsel %vm428_vm2, %v1644_v50, %v4519_v36  ;;  %v2618_v36 = vrot.slane %v4593_v33, 4  ;;  %v2695_v23 = vperm.slane %v4504_v5, %v3376_v18  ;;  %v2647_v18 = vsel %vm260_vm0, 0, %v2646_v62  ;;  %v3044_v62 = vld [vmem:[%s4848_s1 + $0x14] sm:$0xf] }
 0x240   : > { %v1606_v6 = vpop.permute.xlu1 %1605  ;;  %v2736_v60 = vunpack.c.l.b16 %v2691_v54 }
 0x241   : > { %v1648_v27 = vsel %vm431_vm3, %v1646_v38, %v1606_v6  ;;  %v2486_v6 = vpack.c.b16 %v2485_v55, %v2485_v55  ;;  %v2619_v43 = vsel %vm260_vm0, 0, %v2618_v36  ;;  %v2756_v51 = vunpack.c.l.b16 %v2695_v23 }
 0x242   : > { %v2620_v38 = vrot.slane %v2617_v61, 4  ;;  %v2672_v55 = vrot.slane %v2669_v1, 4 }
 0x243   : > { %2432 = vrot.lane.b32.xlu0 %v2431_v14, %s3263_s12  ;;  %v2757_v5 = vpack.c.b16 %v2756_v51, %v2756_v51 }
 0x245   : > { %2437 = vrot.lane.b32.xlu2 %v2436_v9, %s3257_s6  ;;  %v1571_v53 = vpop.permute.xlu0 %1570 }
 0x246   : > { %2442 = vrot.lane.b32.xlu1 %v2441_v30, %s3259_s8  ;;  %v1633_v13 = vsel %vm431_vm3, %v1631_v45, %v1571_v53  ;;  %v2644_v53 = vrot.slane %v2639_v22, 4 }
 0x247   : > { %v4568_v32 = vpop.permute.xlu2 %1876  ;;  %v1635_v10 = vsel %vm434_vm4, %v1633_v13, %v4535_v26  ;;  %v2671_v26 = vsel %vm260_vm0, 0, %v2670_v4  ;;  %v2717_v13 = vpack.c.b16 %v2716_v15, %v2716_v15  ;;  %v2751_v4 = vunpack.c.l.b16 %v2669_v1 }
 0x248   : > { %v1581_v39 = vpop.permute.xlu1 %1580  ;;  %v2741_v30 = vunpack.c.l.b16 %v2671_v26 }
 0x249   : > { %v1637_v19 = vsel %vm437_vm5, %v1635_v10, %v1581_v39  ;;  %v2645_v39 = vsel %vm260_vm0, 0, %v2644_v53 }
 0x24a   : > { %v2742_v29 = vpack.c.b16 %v2741_v30, %v2741_v30  ;;  %v2711_v22 = vunpack.c.l.b16 %v2645_v39  ;;  %v2673_v30 = vsel %vm260_vm0, 0, %v2672_v55 }
 0x24b   : > { %2472 = vrot.lane.b32.xlu0 %v2471_v42, %s3257_s6  ;;  %v2706_v42 = vunpack.c.l.b16 %v2619_v43  ;;  %v2761_v3 = vunpack.c.l.b16 %v2673_v30 }
 0x24c   : > { %v2712_v45 = vpack.c.b16 %v2711_v22, %v2711_v22 }
 0x24d   : > { %2477 = vrot.lane.b32.xlu2 %v2476_v28, %s3259_s8  ;;  %v1611_v8 = vpop.permute.xlu0 %1610  ;;  %v2696_v28 = vrot.slane %v2691_v54, 4  ;;  %v2752_v54 = vpack.c.b16 %v2751_v4, %v2751_v4 }
 0x24e   : > { %2482 = vrot.lane.b32.xlu1 %v2481_v47, %s3262_s11  ;;  %v1650_v41 = vsel %vm434_vm4, %v1648_v27, %v1611_v8  ;;  %v2707_v8 = vpack.c.b16 %v2706_v42, %v2706_v42 }
 0x24f   : > { %v4586_v34 = vpop.permute.xlu2 %1851  ;;  %v1652_v37 = vsel %vm437_vm5, %v1650_v41, %v4543_v44  ;;  %v2697_v52 = vsel %vm260_vm0, 0, %v2696_v28  ;;  %v2731_v41 = vunpack.c.l.b16 %v2647_v18 }
 0x250   : > { %v1621_v59 = vpop.permute.xlu1 %1620 }
 0x251   : > { %v1654_v44 = vsel %vm440_vm6, %v1652_v37, %v1621_v59  ;;  %v2746_v59 = vunpack.c.l.b16 %v2697_v52 }
 0x253   : > { %2447 = vrot.lane.b32.xlu0 %v2446_v40, %s3262_s11 }
 0x255   : > { %2452 = vrot.lane.b32.xlu2 %v2451_v58, %s3261_s10  ;;  %v1586_v17 = vpop.permute.xlu0 %1585  ;;  %v2747_v58 = vpack.c.b16 %v2746_v59, %v2746_v59 }
 0x256   : > { %v1639_v48 = vsel %vm440_vm6, %v1637_v19, %v1586_v17  ;;  %2703 = vrot.lane.b32.xlu1 %v2702_v63, %s3258_s7  ;;  %v2621_v63 = vsel %vm260_vm0, 0, %v2620_v38  ;;  %v2721_v17 = vunpack.c.l.b16 %v2643_v46 }
 0x257   : > { %v1641_v20 = vsel %vm443_vm7, %v1639_v48, %v4560_v35  ;;  %v4613_v14 = vpop.permute.xlu2 %1891  ;;  %v2737_v35 = vpack.c.b16 %v2736_v60, %v2736_v60  ;;  %v2726_v48 = vunpack.c.l.b16 %v2621_v63 }
 0x258   : > { %v1842_v9 = vpop.permute.xlu1 %1841  ;;  %v1662_v21 = vsel %vm720_vm8, %v1641_v20, 0  ;;  %v2698_v20 = vrot.slane %v2695_v23, 4  ;;  %v2722_v60 = vpack.c.b16 %v2721_v17, %v2721_v17 }
 0x259   : > { %1673 = vmatpush.bf16.msra.mxu0 %v1662_v21  ;;  %v1910_v2 = vsel %vm424_vm1, %v4251_v0, %v1842_v9  ;;  %v2727_v0 = vpack.c.b16 %v2726_v48, %v2726_v48  ;;  %v2732_v9 = vpack.c.b16 %v2731_v41, %v2731_v41 }
 0x25a   : > { %v2699_v53 = vsel %vm260_vm0, 0, %v2698_v20  ;;  %vm2855_vm0 = vcmask 57344  }
 0x25b   : > { %2487 = vrot.lane.b32.xlu0 %v2486_v6, %s3261_s10  ;;  %v1925_v6 = vsel %vm424_vm1, %v4213_v12, %v4568_v32  ;;  %v2762_v32 = vpack.c.b16 %v2761_v3, %v2761_v3 }
 0x25d   : > { %2738 = vrot.lane.b32.xlu2 %v2737_v35, %s3258_s7  ;;  %v1626_v56 = vpop.permute.xlu0 %1625  ;;  %s2894_s7 = scalar_lea.hbm %s4850_s3, %s3312_s19 }
 0x25e   : > { %v1656_v7 = vsel %vm443_vm7, %v1654_v44, %v1626_v56  ;;  %2743 = vrot.lane.b32.xlu1 %v2742_v29, %s3260_s9  ;;  %v2766_v44 = vunpack.c.l.b16 %v2699_v53 }
 0x25f   : > { %v1664_v47 = vsel %vm720_vm8, %v1656_v7, 0  ;;  %v1867_v24 = vpop.permute.xlu2 %1866 }
 0x260   : > { %v1882_v49 = vpop.permute.xlu1 %1881  ;;  %1686 = vmatpush.bf16.msra.mxu1 %v1664_v47  ;;  %v2767_v28 = vpack.c.b16 %v2766_v44, %v2766_v44 }
 0x263   : > { %2708 = vrot.lane.b32.xlu0 %v2707_v8, %s3260_s9 }
 0x265   : > { %2713 = vrot.lane.b32.xlu2 %v2712_v45, %s3263_s12  ;;  %v1847_v50 = vpop.permute.xlu0 %1846 }
 0x266   : > { %2718 = vrot.lane.b32.xlu1 %v2717_v13, %s3257_s6  ;;  %v1912_v26 = vsel %vm428_vm2, %v1910_v2, %v1847_v50  ;;  %v3038_v13 = vld [vmem:[%s4848_s1 + $0xc] sm:$0xf] }
 0x267   : > { %v1907_v40 = vpop.permute.xlu2 %1906  ;;  %v1914_v21 = vsel %vm431_vm3, %v1912_v26, %v4586_v34  ;;  %v1927_v34 = vsel %vm428_vm2, %v1925_v6, %v1882_v49  ;;  %3039 = vmatmul.msk.bf16.vlgmr.msrb.gmra.mxu2 %vm716_vm15, %v3038_v13  ;;  %3040 = vmatmul.msk.bf16.vlgmr.msrb.gmra.mxu3 %vm716_vm15, %v3038_v13 }
 0x268   : > { %v1857_v10 = vpop.permute.xlu1 %1856 }
 0x269   : > { %v1916_v37 = vsel %vm434_vm4, %v1914_v21, %v1857_v10 }
 0x26b   : > { %2748 = vrot.lane.b32.xlu0 %v2747_v58, %s3263_s12  ;;  %v3041_v58 = vld [vmem:[%s4848_s1 + $0x10] sm:$0xf]  ;;  %s2883_s12 = sshll.u32 %s4772_s29, 4  ;;  %s2884_s12 = int_to_ptr.vmem [resolvable:$true] %s2883_s12 }
 0x26d   : > { %2753 = vrot.lane.b32.xlu2 %v2752_v54, %s3257_s6  ;;  %v1887_v19 = vpop.permute.xlu0 %1886 }
 0x26e   : > { %2758 = vrot.lane.b32.xlu1 %v2757_v5, %s3259_s8  ;;  %v1929_v29 = vsel %vm431_vm3, %v1927_v34, %v1887_v19 }
 0x26f   : > { %v4651_v27 = vpop.permute.xlu2 %2146  ;;  %v1931_v42 = vsel %vm434_vm4, %v1929_v29, %v4613_v14  ;;  %v3035_v14 = vld [vmem:[%s4848_s1 + $0x8] sm:$0xf] }
 0x270   : > { %v1897_v36 = vpop.permute.xlu1 %1896  ;;  %3037 = vmatmul.msk.bf16.vlgmr.msrb.gmra.mxu1 %vm716_vm15, %v3035_v14  ;;  %3036 = vmatmul.msk.bf16.vlgmr.msrb.gmra.mxu0 %vm716_vm15, %v3035_v14 }
 0x271   : > { %v1933_v47 = vsel %vm437_vm5, %v1931_v42, %v1897_v36 }
 0x273   : > { %2723 = vrot.lane.b32.xlu0 %v2722_v60, %s3259_s8  ;;  %s200_s8 = scalar_lea.vmem [#allocation4], %s4769_s27 }
 0x274   : > { %s2896_s9 = sshll.u32 %s200_s8, 4  ;;  %s2897_s9 = int_to_ptr.vmem [resolvable:$true] %s2896_s9 }
 0x275   : > { %2728 = vrot.lane.b32.xlu2 %v2727_v0, %s3262_s11  ;;  %v1862_v43 = vpop.permute.xlu0 %1861  ;;  %v3051_v0 = vld [vmem:[%s4848_s1 + $0x18] sm:$0xf] }
 0x276   : > { %v1918_v35 = vsel %vm437_vm5, %v1916_v37, %v1862_v43  ;;  %2733 = vrot.lane.b32.xlu1 %v2732_v9, %s3261_s10 }
 0x277   : > { %v2187_v39 = vpop.permute.xlu2 %2186  ;;  %v1920_v61 = vsel %vm440_vm6, %v1918_v35, %v1867_v24 }
 0x278   : > { %v1872_v56 = vpop.permute.xlu1 %1871 }
 0x279   : > { %v1922_v12 = vsel %vm443_vm7, %v1920_v61, %v1872_v56 }
 0x27a   : > { %v1943_v7 = vsel %vm720_vm8, %v1922_v12, 0 }
 0x27b   : > { %2763 = vrot.lane.b32.xlu0 %v2762_v32, %s3262_s11  ;;  %1954 = vmatpush.bf16.msra.mxu2 %v1943_v7  ;;  %s3065_s11 = sshll.u32 %s3312_s19, 3 }
 0x27d   : > { %2768 = vrot.lane.b32.xlu2 %v2767_v28, %s3261_s10  ;;  %v1902_v22 = vpop.permute.xlu0 %1901  ;;  %s2898_s10 = sshll.u32 %s2894_s7, 4  ;;  %s2899_s10 = int_to_ptr.hbm [resolvable:$true] %s2898_s10 }
 0x27e   : > { %v1935_v24 = vsel %vm440_vm6, %v1933_v47, %v1902_v22  ;;  %3045 = vmatmul.msk.bf16.vlgmr.msra.gmra.mxu2 %vm716_vm15, %v3044_v62  ;;  %s3145_s14 = sshra.s32 %s2899_s10, 4  ;;  %s3146_s14 = int_to_ptr.hbm [resolvable:$true] %s3145_s14 }
 0x27f   : > { %v1937_v49 = vsel %vm443_vm7, %v1935_v24, %v1907_v40  ;;  %v2162_v15 = vpop.permute.xlu2 %2161  ;;  %s3147_s22 = scalar_lea.hbm %s3146_s14, 1  ;;  %p3152_p0 = scmp.lt.s32.totalorder %s3146_s14, %s4850_s3 }
 0x280   : > { %v2177_v8 = vpop.permute.xlu1 %2176  ;;  %v1945_v52 = vsel %vm720_vm8, %v1937_v49, 0  ;;  %3042 = vmatmul.msk.bf16.vlgmr.msra.gmra.mxu0 %vm716_vm15, %v3041_v58  ;;  %3043 = vmatmul.msk.bf16.vlgmr.msra.gmra.mxu1 %vm716_vm15, %v3041_v58  ;;  %v3054_v49 = vld [vmem:[%s4848_s1 + $0x1c] sm:$0xf]  ;;  %p3148_p11 = scmp.ne.s32.totalorder %s3146_s14, %s3147_s22  ;;  %p3153_p1 = scmp.lt.s32.totalorder %s3151_s5, %s3147_s22 }
 0x281   : > { %1967 = vmatpush.bf16.msra.mxu3 %v1945_v52  ;;  %v2225_v4 = vsel %vm424_vm1, %v4448_v31, %v2177_v8 }
 0x282   : > { %p3149_p12 = pnand %p3148_p11, %p3331_p5  ;;  %p3154_p2 = por %p3153_p1, %p3152_p0 }
 0x284   : > { %3046 = vmatmul.msk.bf16.vlgmr.msra.gmra.mxu3 %vm716_vm15, %v3044_v62  ;;  %p3150_p13 = pneg %p3149_p12 }
 0x285   : > { %v2142_v45 = vpop.permute.xlu0 %2141 }
 0x286   : > { %v2210_v51 = vsel %vm424_vm1, %v4428_v25, %v2142_v45  ;;  %p3155_p3 = pnand %p3154_p2, %p3150_p13 }
 0x287   : > { %v2202_v23 = vpop.permute.xlu2 %2201  ;;  %v2212_v31 = vsel %vm428_vm2, %v2210_v51, %v4651_v27 }
 0x288   : > { %v2152_v1 = vpop.permute.xlu1 %2151 }
 0x289   : > { %v2214_v63 = vsel %vm431_vm3, %v2212_v31, %v2152_v1 }
 0x28d   : > { %v2182_v50 = vpop.permute.xlu0 %2181 }
 0x28e   : > { %v2227_v10 = vsel %vm428_vm2, %v2225_v4, %v2182_v50  ;;  %v747_v50 = vpop.f32.mrf.mxu1 }
 0x28f   : > { %v2423_v46 = vpop.permute.xlu2 %2422  ;;  %v2229_v54 = vsel %vm431_vm3, %v2227_v10, %v2187_v39 }
 0x290   : > { %v2192_v59 = vpop.permute.xlu1 %2191  ;;  %v2491_v34 = vsel %vm424_vm1, %v4515_v11, %v2423_v46 }
 0x291   : > { %v2231_v25 = vsel %vm434_vm4, %v2229_v54, %v2192_v59 }
 0x295   : > { %v2157_v40 = vpop.permute.xlu0 %2156 }
 0x296   : > { %v2216_v18 = vsel %vm434_vm4, %v2214_v63, %v2157_v40  ;;  %v749_v10 = vpop.f32.mrf.mxu1 }
 0x297   : > { %v2463_v19 = vpop.permute.xlu2 %2462  ;;  %v2218_v27 = vsel %vm437_vm5, %v2216_v18, %v2162_v15 }
 0x298   : > { %v2167_v38 = vpop.permute.xlu1 %2166 }
 0x299   : > { %v2220_v36 = vsel %vm440_vm6, %v2218_v27, %v2167_v38 }
 0x29d   : > { %v2197_v5 = vpop.permute.xlu0 %2196 }
 0x29e   : > { %v2233_v17 = vsel %vm437_vm5, %v2231_v25, %v2197_v5 }
 0x29f   : > { %v2235_v2 = vsel %vm440_vm6, %v2233_v17, %v2202_v23  ;;  %v2438_v21 = vpop.permute.xlu2 %2437  ;;  %v734_v23 = vpop.f32.mrf.mxu0 }
 0x2a0   : > { %v2207_v55 = vpop.permute.xlu1 %2206 }
 0x2a1   : > { %v2237_v26 = vsel %vm443_vm7, %v2235_v2, %v2207_v55 }
 0x2a2   : > { %v2245_v48 = vsel %vm720_vm8, %v2237_v26, 0 }
 0x2a3   : > { %2267 = vmatpush.bf16.msrb.mxu1 %v2245_v48 }
 0x2a4   : > { %v767_v58 = vpop.f32.mrf.mxu2  ;;  %v780_v31 = vpop.f32.mrf.mxu3 }
 0x2a5   : > { %v2172_v41 = vpop.permute.xlu0 %2171  ;;  %v768_v54 = vadd.f32 %v767_v58, %v734_v23  ;;  %v781_v5 = vadd.f32 %v780_v31, %v747_v50 }
 0x2a6   : > { %v2222_v20 = vsel %vm443_vm7, %v2220_v36, %v2172_v41  ;;  %3053 = vmatmul.msk.bf16.vlgmr.msrb.gmra.mxu1 %vm716_vm15, %v3051_v0 }
 0x2a7   : > { %v2243_v60 = vsel %vm720_vm8, %v2222_v20, 0  ;;  %v2478_v6 = vpop.permute.xlu2 %2477  ;;  %v736_v4 = vpop.f32.mrf.mxu0 }
 0x2a8   : > { %v2428_v30 = vpop.permute.xlu1 %2427  ;;  %2254 = vmatpush.bf16.msrb.mxu0 %v2243_v60 }
 0x2a9   : > { %v2493_v29 = vsel %vm428_vm2, %v2491_v34, %v2428_v30 }
 0x2ab   : > { %3052 = vmatmul.msk.bf16.vlgmr.msrb.gmra.mxu0 %vm716_vm15, %v3051_v0 }
 0x2ac   : > { %v769_v26 = vpop.f32.mrf.mxu2  ;;  %v782_v36 = vpop.f32.mrf.mxu3 }
 0x2ad   : > { %v2458_v9 = vpop.permute.xlu0 %2457 }
 0x2ae   : > { %v2506_v61 = vsel %vm424_vm1, %v4528_v57, %v2458_v9 }
 0x2af   : > { %v2453_v3 = vpop.permute.xlu2 %2452  ;;  %v2508_v12 = vsel %vm428_vm2, %v2506_v61, %v2463_v19 }
 0x2b0   : > { %v2468_v53 = vpop.permute.xlu1 %2467 }
 0x2b1   : > { %v2510_v7 = vsel %vm431_vm3, %v2508_v12, %v2468_v53 }
 0x2b5   : > { %v2433_v37 = vpop.permute.xlu0 %2432 }
 0x2b6   : > { %v2495_v39 = vsel %vm431_vm3, %v2493_v29, %v2433_v37 }
 0x2b7   : > { %v2497_v56 = vsel %vm434_vm4, %v2495_v39, %v2438_v21  ;;  %v2739_v28 = vpop.permute.xlu2 %2738  ;;  %v3057_v21 = vld [vmem:[%s4848_s1 + $0x20] sm:$0xf] }
 0x2b8   : > { %v2443_v43 = vpop.permute.xlu1 %2442  ;;  %v2787_v17 = vsel %vm424_vm1, %v4577_v16, %v2739_v28 }
 0x2b9   : > { %v2499_v32 = vsel %vm437_vm5, %v2497_v56, %v2443_v43 }
 0x2bd   : > { %v2473_v35 = vpop.permute.xlu0 %2472 }
 0x2be   : > { %v2512_v47 = vsel %vm434_vm4, %v2510_v7, %v2473_v35 }
 0x2bf   : > { %v2514_v15 = vsel %vm437_vm5, %v2512_v47, %v2478_v6  ;;  %v2714_v1 = vpop.permute.xlu2 %2713 }
 0x2c0   : > { %v2483_v44 = vpop.permute.xlu1 %2482 }
 0x2c1   : > { %v2516_v8 = vsel %vm440_vm6, %v2514_v15, %v2483_v44 }
 0x2c5   : > { %v2448_v42 = vpop.permute.xlu0 %2447 }
 0x2c6   : > { %v2501_v11 = vsel %vm440_vm6, %v2499_v32, %v2448_v42 }
 0x2c7   : > { %v2503_v22 = vsel %vm443_vm7, %v2501_v11, %v2453_v3  ;;  %v2754_v40 = vpop.permute.xlu2 %2753 }
 0x2c8   : > { %v2704_v24 = vpop.permute.xlu1 %2703  ;;  %v2524_v57 = vsel %vm720_vm8, %v2503_v22, 0 }
 0x2c9   : > { %2535 = vmatpush.bf16.msrb.mxu2 %v2524_v57  ;;  %v2772_v38 = vsel %vm424_vm1, %v4593_v33, %v2704_v24 }
 0x2cc   : > { %3055 = vmatmul.msk.bf16.vlgmr.msrb.gmra.mxu2 %vm716_vm15, %v3054_v49 }
 0x2cd   : > { %v2488_v52 = vpop.permute.xlu0 %2487 }
 0x2ce   : > { %v2518_v14 = vsel %vm443_vm7, %v2516_v8, %v2488_v52 }
 0x2cf   : > { %v2526_v45 = vsel %vm720_vm8, %v2518_v14, 0  ;;  %v2729_v19 = vpop.permute.xlu2 %2728 }
 0x2d0   : > { %v2744_v13 = vpop.permute.xlu1 %2743  ;;  %2548 = vmatpush.bf16.msrb.mxu3 %v2526_v45 }
 0x2d1   : > { %v2789_v55 = vsel %vm428_vm2, %v2787_v17, %v2744_v13  ;;  %v2851_v17 = vlaneseq }
 0x2d3   : > { %3056 = vmatmul.msk.bf16.vlgmr.msrb.gmra.mxu3 %vm716_vm15, %v3054_v49 }
 0x2d5   : > { %v2709_v59 = vpop.permute.xlu0 %2708 }
 0x2d6   : > { %v2774_v62 = vsel %vm428_vm2, %v2772_v38, %v2709_v59 }
 0x2d7   : > { %v2776_v63 = vsel %vm431_vm3, %v2774_v62, %v2714_v1  ;;  %v2769_v9 = vpop.permute.xlu2 %2768 }
 0x2d8   : > { %v2719_v46 = vpop.permute.xlu1 %2718 }
 0x2d9   : > { %v2778_v18 = vsel %vm434_vm4, %v2776_v63, %v2719_v46 }
 0x2dd   : > { %v2749_v51 = vpop.permute.xlu0 %2748 }
 0x2de   : > { %v2791_v27 = vsel %vm431_vm3, %v2789_v55, %v2749_v51 }
 0x2df   : > { %v2793_v60 = vsel %vm434_vm4, %v2791_v27, %v2754_v40 }
 0x2e0   : > { %v2759_v25 = vpop.permute.xlu1 %2758 }
 0x2e1   : > { %v2795_v30 = vsel %vm437_vm5, %v2793_v60, %v2759_v25 }
 0x2e5   : > { %v2724_v2 = vpop.permute.xlu0 %2723 }
 0x2e6   : > { %v2780_v33 = vsel %vm437_vm5, %v2778_v18, %v2724_v2  ;;  %v2852_v18 = vand.u32 127, %v2851_v17 }
 0x2e7   : > { %v2782_v48 = vsel %vm440_vm6, %v2780_v33, %v2729_v19 }
 0x2e8   : > { %v2734_v41 = vpop.permute.xlu1 %2733 }
 0x2e9   : > { %v2784_v20 = vsel %vm443_vm7, %v2782_v48, %v2734_v41 }
 0x2ea   : > { %v2805_v16 = vsel %vm720_vm8, %v2784_v20, 0  ;;  %v1394_v61 = vpop.f32.mrf.mxu2  ;;  %v1407_v44 = vpop.f32.mrf.mxu3 }
 0x2eb   : > { %2816 = vmatpush.bf16.msra.mxu0 %v2805_v16 }
 0x2ed   : > { %v2764_v0 = vpop.permute.xlu0 %2763  ;;  %v1046_v43 = vpop.f32.mrf.mxu0 }
 0x2ee   : > { %v2797_v53 = vsel %vm440_vm6, %v2795_v30, %v2764_v0  ;;  %3058 = vmatmul.msk.bf16.vlgmr.msra.gmra.mxu0 %vm716_vm15, %v3057_v21  ;;  %v1059_v3 = vpop.f32.mrf.mxu1  ;;  %v1063_v34 = vadd.f32 %v1046_v43, %v768_v54 }
 0x2ef   : > { %v2799_v6 = vsel %vm443_vm7, %v2797_v53, %v2769_v9  ;;  %v1064_v35 = vadd.f32 %v1059_v3, %v781_v5 }
 0x2f0   : > { %v2807_v37 = vsel %vm720_vm8, %v2799_v6, 0  ;;  %v1411_v56 = vadd.f32 %v1394_v61, %v1063_v34 }
 0x2f1   : > { %2829 = vmatpush.bf16.msra.mxu1 %v2807_v37  ;;  %v1412_v12 = vadd.f32 %v1407_v44, %v1064_v35 }
 0x2f2   : > { %v1396_v32 = vpop.f32.mrf.mxu2  ;;  %v1409_v42 = vpop.f32.mrf.mxu3 }
 0x2f4   : > { %3059 = vmatmul.msk.bf16.vlgmr.msra.gmra.mxu1 %vm716_vm15, %v3057_v21 }
 0x2f5   : > { %v1048_v29 = vpop.f32.mrf.mxu0 }
 0x2f6   : > { %v1061_v39 = vpop.f32.mrf.mxu1 }
 0x2fd   : > { %v1675_v7 = vpop.f32.mrf.mxu0 }
 0x2fe   : > { %v1688_v28 = vpop.f32.mrf.mxu1  ;;  %v1692_v11 = vadd.f32 %v1675_v7, %v1411_v56 }
 0x2ff   : > { %v1693_v47 = vadd.f32 %v1688_v28, %v1412_v12 }
 0x301   : > { %v1956_v22 = vpop.f32.mrf.mxu2 }
 0x302   : > { %v1973_v57 = vadd.f32 %v1956_v22, %v1692_v11 }
 0x305   : > { %v1677_v49 = vpop.f32.mrf.mxu0 }
 0x306   : > { %v1690_v15 = vpop.f32.mrf.mxu1 }
 0x307   : > { %v1969_v24 = vpop.f32.mrf.mxu3 }
 0x308   : > { %v1974_v8 = vadd.f32 %v1969_v24, %v1693_v47 }
 0x309   : > { %v1958_v52 = vpop.f32.mrf.mxu2 }
 0x30f   : > { %v1971_v14 = vpop.f32.mrf.mxu3 }
 0x323   : > { %v2269_v45 = vpop.f32.mrf.mxu1 }
 0x324   : > { %v2274_v13 = vadd.f32 %v2269_v45, %v1974_v8 }
 0x328   : > { %v2256_v1 = vpop.f32.mrf.mxu0 }
 0x329   : > { %v2273_v23 = vadd.f32 %v2256_v1, %v1973_v57 }
 0x32b   : > { %v2271_v50 = vpop.f32.mrf.mxu1 }
 0x330   : > { %v2258_v59 = vpop.f32.mrf.mxu0 }
 0x34f   : > { %v2537_v46 = vpop.f32.mrf.mxu2 }
 0x350   : > { %v2554_v38 = vadd.f32 %v2537_v46, %v2273_v23 }
 0x356   : > { %v2550_v40 = vpop.f32.mrf.mxu3 }
 0x357   : > { %v2539_v4 = vpop.f32.mrf.mxu2  ;;  %v2555_v58 = vadd.f32 %v2550_v40, %v2274_v13 }
 0x35e   : > { %v2552_v10 = vpop.f32.mrf.mxu3 }
 0x36b   : > { %v2818_v51 = vpop.f32.mrf.mxu0 }
 0x36c   : > { %v2835_v54 = vadd.f32 %v2818_v51, %v2554_v38 }
 0x371   : > { %v2831_v62 = vpop.f32.mrf.mxu1 }
 0x372   : > { %v2836_v31 = vadd.f32 %v2831_v62, %v2555_v58 }
 0x373   : > { %v2820_v25 = vpop.f32.mrf.mxu0 }
 0x374   : > { %v2837_v5 = vpack.c.bf16 %v2836_v31, %v2835_v54  ;;  %v2839_v63 = vadd.f32 %v2836_v31, %v2835_v54 }
 0x376   : > { %2840 = vadd.xlane.f32.xlu0 %v2839_v63  ;;  %2838 = vst [vmem:[%s4772_s29] sm:$0xff] %v2837_v5 }
 0x379   : > { %v2833_v19 = vpop.f32.mrf.mxu1 }
 0x3e9   : > { %v2841_v2 = vpop.xlane.xlu0 %2840 }
 0x3ea   : > { %v2842_v55 = vmul.f32 0.00390625, %v2841_v2  ;;  %v2853_v33 = vperm.slane %v2841_v2, %v2852_v18 }
 0x3ec   : > { %v2843_v26 = vsub.f32 %v2835_v54, %v2842_v55  ;;  %v2844_v27 = vsub.f32 %v2836_v31, %v2842_v55  ;;  %2856 = vst.msk [vmem:[%s200_s8] sm:$0x1] %vm2855_vm0, %v2853_v33 }
 0x3ed   : > { %3158 = shalt.err (!%p3155_p3)
}
 0x3ee   : > { %3068 = dma.vmem_to_hbm [thread:$0]  (%p3331_p5), %s2897_s9, 16, %s2899_s10, %s4784_s13   ;;  %v2845_v48 = vmul.f32 %v2843_v26, %v2843_v26  ;;  %v2846_v36 = vmul.f32 %v2844_v27, %v2844_v27 }
 0x3ef   : > { %s2881_s8 = scalar_lea.hbm %s4849_s2, %s3065_s11  ;;  %s2862_s14 = scalar_lea.sflag [#allocation3], %s4769_s27 }
 0x3f0   : > { %s2885_s23 = sshll.u32 %s2881_s8, 4  ;;  %v2847_v41 = vadd.f32 %v2846_v36, %v2845_v48  ;;  %s3179_s10 = scalar_lea.hbm %s4849_s2, 16  ;;  %s2886_s23 = int_to_ptr.hbm [resolvable:$true] %s2885_s23 }
 0x3f1   : > { %s3173_s22 = sshra.s32 %s2886_s23, 4  ;;  %s3174_s22 = int_to_ptr.hbm [resolvable:$true] %s3173_s22 }
 0x3f2   : > { %s3175_s28 = scalar_lea.hbm %s3174_s22, 8  ;;  %p3180_p9 = scmp.lt.s32.totalorder %s3174_s22, %s4849_s2 }
 0x3f3   : > { %p3176_p4 = scmp.ne.s32.totalorder %s3174_s22, %s3175_s28  ;;  %p3181_p10 = scmp.lt.s32.totalorder %s3179_s10, %s3175_s28 }
 0x3f5   : > { %p3177_p7 = pnand %p3176_p4, %p3331_p5  ;;  %p3182_p11 = por %p3181_p10, %p3180_p9 }
 0x3f7   : > { %p3178_p8 = pneg %p3177_p7 }
 0x3f9   : > { %p3183_p12 = pnand %p3182_p11, %p3178_p8 }
 0x3fb   : > { %3186 = shalt.err (!%p3183_p12)
}
 0x3fc   : > { %3067 = dma.vmem_to_hbm [thread:$0]  (%p3331_p5), %s2884_s12, 128, %s2886_s23, %s2862_s14   ;;  %2848 = vadd.xlane.f32.xlu1 %v2847_v41 }
 0x3fd   : > { %s2907_s30 = scalar_lea.hbm %s4851_s4, %s3312_s19  ;;  %s206_s8 = scalar_lea.vmem [#allocation6], %s4769_s27 }
 0x3fe   : > { %s2909_s5 = sshll.u32 %s206_s8, 4  ;;  %s2911_s9 = sshll.u32 %s2907_s30, 4  ;;  %s2910_s5 = int_to_ptr.vmem [resolvable:$true] %s2909_s5  ;;  %s2912_s9 = int_to_ptr.hbm [resolvable:$true] %s2911_s9 }
 0x3ff   : > { %s3201_s22 = sshra.s32 %s2912_s9, 4  ;;  %s3207_s19 = scalar_lea.hbm %s4851_s4, 2  ;;  %s3202_s22 = int_to_ptr.hbm [resolvable:$true] %s3201_s22 }
 0x400   : > { %s3203_s28 = scalar_lea.hbm %s3202_s22, 1  ;;  %p3208_p2 = scmp.lt.s32.totalorder %s3202_s22, %s4851_s4 }
 0x401   : > { %p3204_p13 = scmp.ne.s32.totalorder %s3202_s22, %s3203_s28  ;;  %p3209_p3 = scmp.lt.s32.totalorder %s3207_s19, %s3203_s28 }
 0x403   : > { %p3205_p0 = pnand %p3204_p13, %p3331_p5  ;;  %p3210_p4 = por %p3209_p3, %p3208_p2 }
 0x405   : > { %p3206_p1 = pneg %p3205_p0 }
 0x407   : > { %p3211_p7 = pnand %p3210_p4, %p3206_p1 }
 0x46f   : > { %v2849_v20 = vpop.xlane.xlu1 %2848 }
 0x470   : > { %v2858_v60 = vperm.slane %v2849_v20, %v2852_v18 }
 0x472   : > { %2860 = vst.msk [vmem:[%s206_s8] sm:$0x1] %vm2855_vm0, %v2858_v60 }
 0x473   : > { %3214 = shalt.err (!%p3211_p7)
}
 0x474   : > { %3069 = dma.vmem_to_hbm [thread:$0]  (%p3331_p5), %s2910_s5, 16, %s2912_s9, %s4784_s13  }
 0x475 PF: > { %p3083_p8 = scmp.ge.s32.totalorder %s3253_s18, 2  ;;  %s2923_s10 = sand.u32 1, %s3241_s15  }
 0x476   : > { %s2924_s6 = scalar_lea.sflag [#allocation3], %s2923_s10 }
 0x477   : > { %p3074_p9 = pnand %p3083_p8, %p3335_p6 }
 0x479   : > { %p3075_p10 = pneg %p3074_p9 }
 0x47b   : > { %3232 = dma.done.wait (%p3075_p10), %s2924_s6, 128  }
 0x47c   : > { %3234 = vsyncadd (%p3075_p10), %s2924_s6, 4294967168  ;;  %s2933_s7 = sand.u32 1, %s3024_s20  }
 0x47d   : > { %s2934_s11 = scalar_lea.sflag [#allocation5], %s2933_s7 }
 0x47e   : > { %3236 = dma.done.wait (%p3075_p10), %s2934_s11, 32  }
 0x47f   : > { %3238 = vsyncadd (%p3075_p10), %s2934_s11, 4294967264  ;;  %p18_p5 = scmp.ge.s32.totalorder %s3316_s21, 4   ;;  %s4858_s15 = smov %s3245_s16 }
 0x480   : > { %s4859_s16 = smov %s3249_s17  ;;  %s4860_s17 = smov %s3329_s24 }
 0x481   : > { %s4861_s18 = smov %s3316_s21  ;;  %20 = sbr.rel (!%p18_p5) target bundleno = 5 (0x5), region = 103 }
 0x486   :  { %2948 = vsyncpa [#allocation3], 1 }
 0x487   :  { %2950 = vsyncpa [#allocation3 + $0x1], 1 }
 0x488   :  { %2951 = vsyncpa [#allocation5], 1 }
 0x489   :  { %2953 = vsyncpa [#allocation5 + $0x1], 1 }

</bundles_post_ra>
